<compile_context>
chip_gen: v7x
topology: tpu7x:2x2x1
jax: 0.10.0
libtpu: 0.0.40
codegen_flags: <defaults>
</compile_context>

<pallas_src>
import functools

import jax
import jax.numpy as jnp
from jax.experimental import pallas as pl
from jax.experimental.pallas import tpu as pltpu

IGNORE_INDEX = -1
_UNROLL_C_MAX = 32  # unroll class-axis work onto the VPU for small C


# ---------------------------------------------------------------------------
# class-axis helpers on a (C, TQ, 128) tile (classes on the leading axis,
# pixels sublane/lane dense)
# ---------------------------------------------------------------------------
def _class_max(x):
    C = x.shape[0]
    if C <= _UNROLL_C_MAX:
        m = x[0]
        for c in range(1, C):
            m = jnp.maximum(m, x[c])
        return m
    return jnp.max(x, axis=0)


def _class_sum_exp(x, m):
    C = x.shape[0]
    if C <= _UNROLL_C_MAX:
        s = jnp.exp(x[0] - m)
        for c in range(1, C):
            s = s + jnp.exp(x[c] - m)
        return s
    return jnp.sum(jnp.exp(x - m), axis=0)


def _class_argmax(x, m):
    """Lowest class index attaining the max. -> (TQ, 128) int32."""
    C = x.shape[0]
    if C <= _UNROLL_C_MAX:
        idx = jnp.full(m.shape, C, jnp.int32)
        for c in range(C - 1, -1, -1):
            idx = jnp.where(x[c] == m, jnp.int32(c), idx)
        return idx
    iota = jax.lax.broadcasted_iota(jnp.int32, x.shape, 0)
    return jnp.min(jnp.where(x == m, iota, C), axis=0)


def _gather_class(x, labels, mask):
    """x[labels[p], p] where mask, else 0.  x:(C,TQ,128) labels/mask:(TQ,128)."""
    C = x.shape[0]
    safe = jnp.where(mask, labels, 0)
    if C <= _UNROLL_C_MAX:
        g = jnp.zeros(labels.shape, jnp.float32)
        for c in range(C):
            g = jnp.where(safe == c, x[c], g)
        return g
    iota = jax.lax.broadcasted_iota(jnp.int32, x.shape, 0)
    return jnp.sum(jnp.where(iota == safe, x, 0.0), axis=0)


# ---------------------------------------------------------------------------
# fused kernel: supervised CE + all CPS pair terms for one pixel tile
# ---------------------------------------------------------------------------
def _fused_loss_kernel(tgt_ref, pl_ref, pu_ref, out_ref, *, n_models, thresh,
                       tq, hw_valid, hw_total):
    M = n_models
    t_id = pl.program_id(1)

    # zero this batch element's accumulator row at its first pixel tile
    @pl.when(t_id == 0)
    def _():
        out_ref[...] = jnp.zeros_like(out_ref)

    def acc(q, contrib):  # contrib: (tq, 128) float32 -> dense VPU adds only
        out_ref[0, q] += contrib.reshape(tq // 8, 8, 128).sum(axis=0)

    # mask for pixels added by the HW padding (trace-time constant branch)
    needs_pad_mask = hw_valid < hw_total
    if needs_pad_mask:
        row = jax.lax.broadcasted_iota(jnp.int32, (tq, 128), 0)
        lane = jax.lax.broadcasted_iota(jnp.int32, (tq, 128), 1)
        in_image = ((t_id * tq + row) * 128 + lane) < hw_valid
    else:
        in_image = None

    # ---- supervised CE over the labeled heads (same valid count for all) ----
    tgt = tgt_ref[0]                          # (tq, 128) int32; padding is -1
    valid = tgt != IGNORE_INDEX
    sup = jnp.zeros((tq, 128), jnp.float32)
    for j in range(M):
        x = pl_ref[j, 0].astype(jnp.float32)  # (C, tq, 128)
        mx = _class_max(x)
        lse = mx + jnp.log(_class_sum_exp(x, mx))
        tl = _gather_class(x, tgt, valid)
        sup = sup + jnp.where(valid, lse - tl, 0.0)
    acc(0, sup)
    acc(1, valid.astype(jnp.float32))

    # ---- per unlabeled head: lse, argmax pseudo-label, confidence mask ----
    xs = [pu_ref[m, 0].astype(jnp.float32) for m in range(M)]   # hoisted once
    lses, argmaxes, confs = [], [], []
    for m in range(M):
        x = xs[m]
        mx = _class_max(x)
        se = _class_sum_exp(x, mx)
        lses.append(mx + jnp.log(se))
        argmaxes.append(_class_argmax(x, mx))
        if thresh > 0.5:
            # max(softmax) >= thresh  <=>  sum(exp(x - max)) <= 1/thresh
            conf = se <= jnp.float32(1.0 / thresh)
            if needs_pad_mask:
                conf = conf & in_image
        else:
            # plain argmax pseudo-labels: every (non-padded) pixel counts
            conf = in_image if needs_pad_mask else jnp.full((tq, 128), True)
        confs.append(conf)
        acc(2 + m, conf.astype(jnp.float32))

    # ---- ordered CPS pair sums: (pred=l, teacher=r) and (pred=r, teacher=l) --
    k = 0
    for r in range(M):
        for l in range(r):
            for p, t in ((l, r), (r, l)):
                tl = _gather_class(xs[p], argmaxes[t], confs[t])
                acc(2 + M + k, jnp.where(confs[t], lses[p] - tl, 0.0))
                k += 1


# ---------------------------------------------------------------------------
# wrapper
# ---------------------------------------------------------------------------
def _pick_tq(rows, n_models, n_classes, itemsize, budget_bytes=20 << 20):
    """Sublane rows (of 128 pixels) per tile; multiple of 8 dividing `rows`."""
    # per-row bytes: double-buffered L & U inputs + f32 work copies/intermediates
    per_row = 128 * n_classes * (2 * 2 * n_models * itemsize
                                 + (n_models + 2) * 4)
    cap = max(8, budget_bytes // max(per_row, 1))
    cap = min(cap, rows, 64)
    tq = max(8, (cap // 8) * 8)
    while tq > 8 and rows % tq != 0:
        tq -= 8
    return tq


@functools.partial(
    jax.jit,
    static_argnames=("n_models", "trade_off_factor",
                     "pseudo_label_confidence_threshold"))
def combined_cps_loss(targets, preds_L, preds_U, *, n_models=3,
                      trade_off_factor=1.5,
                      pseudo_label_confidence_threshold=0.7):
    """Default-path CombinedCPSLoss forward.  targets:(N,H,W) int,
    preds_L/preds_U:(N,C,H,W,n_models).  Returns shape (1,)."""
    N, C, H, W, M = preds_L.shape
    assert M == n_models
    HW = H * W
    HW_pad = ((HW + 1023) // 1024) * 1024        # rows multiple of 8
    R = HW_pad // 128

    # Model axis to the front once (single pass per tensor); pixels stay the
    # lane-dense minor H*W axis of the native NCHW layout (no NHWC transpose).
    pL = jnp.moveaxis(preds_L, -1, 0).reshape(M, N, C, HW)
    pU = jnp.moveaxis(preds_U, -1, 0).reshape(M, N, C, HW)
    tgt = targets.reshape(N, HW).astype(jnp.int32)
    if HW_pad != HW:
        pad = HW_pad - HW
        pL = jnp.pad(pL, ((0, 0), (0, 0), (0, 0), (0, pad)))
        pU = jnp.pad(pU, ((0, 0), (0, 0), (0, 0), (0, pad)))
        tgt = jnp.pad(tgt, ((0, 0), (0, pad)), constant_values=IGNORE_INDEX)
    pL = pL.reshape(M, N, C, R, 128)
    pU = pU.reshape(M, N, C, R, 128)
    tgt = tgt.reshape(N, R, 128)

    TQ = _pick_tq(R, M, C, jnp.dtype(preds_U.dtype).itemsize)
    T = R // TQ
    n_out = 2 + M + M * (M - 1)

    kernel = functools.partial(
        _fused_loss_kernel, n_models=M,
        thresh=float(pseudo_label_confidence_threshold),
        tq=TQ, hw_valid=HW, hw_total=HW_pad)

    out = pl.pallas_call(
        kernel,
        out_shape=jax.ShapeDtypeStruct((N, n_out, 8, 128), jnp.float32),
        grid_spec=pltpu.PrefetchScalarGridSpec(
            num_scalar_prefetch=0,
            grid=(N, T),
            in_specs=[
                pl.BlockSpec((1, TQ, 128), lambda n, t: (n, t, 0)),          # targets
                pl.BlockSpec((M, 1, C, TQ, 128), lambda n, t: (0, n, 0, t, 0)),  # preds_L
                pl.BlockSpec((M, 1, C, TQ, 128), lambda n, t: (0, n, 0, t, 0)),  # preds_U
            ],
            out_specs=pl.BlockSpec((1, n_out, 8, 128),
                                   lambda n, t: (n, 0, 0, 0)),
        ),
        compiler_params=pltpu.CompilerParams(
            dimension_semantics=("parallel", "arbitrary"),
            vmem_limit_bytes=48 << 20),
    )(tgt, pL, pU)

    # Tiny final reduction done by XLA: (N, n_out, 8, 128) -> (n_out,)
    sums = jnp.sum(out, axis=(0, 2, 3))

    # supervised CE: same valid count for all heads -> sum of means = sums/count
    ce_loss = sums[0] / sums[1]               # NaN if no valid target (as torch)

    counts = sums[2:2 + M]                    # confident-pixel count per teacher
    pair_sums = sums[2 + M:]
    cps_loss = jnp.float32(0.0)
    k = 0
    for r in range(M):
        for l in range(r):
            cps_loss = cps_loss + pair_sums[k] / counts[r]   # loss(P_l, Y_r)
            k += 1
            cps_loss = cps_loss + pair_sums[k] / counts[l]   # loss(P_r, Y_l)
            k += 1
    # reference zeroes the *summed* cps_loss if it is NaN
    cps_loss = jnp.where(jnp.isnan(cps_loss), jnp.float32(0.0), cps_loss)

    combined = (ce_loss +
                (trade_off_factor / (n_models - 1)) * cps_loss) / n_models
    return combined.reshape(1)


# ---------------------------------------------------------------------------
# pure-JAX reference (for self-check)
# ---------------------------------------------------------------------------
def _reference_loss(targets, preds_L, preds_U, n_models=3, trade_off_factor=1.5,
                    thresh=0.7):
    M = n_models

    def ce(logits, labels):                 # logits (N,C,H,W), labels (N,H,W)
        lp = jax.nn.log_softmax(logits.astype(jnp.float32), axis=1)
        valid = labels != IGNORE_INDEX
        safe = jnp.where(valid, labels, 0)
        g = jnp.take_along_axis(lp, safe[:, None, :, :], axis=1)[:, 0]
        return (jnp.sum(jnp.where(valid, -g, 0.0)) /
                jnp.sum(valid).astype(jnp.float32))

    def pseudo(logits):
        sm = jax.nn.softmax(logits.astype(jnp.float32), axis=1)
        am = jnp.argmax(logits, axis=1).astype(jnp.int32)
        if thresh > 0.5:
            conf = jnp.max(sm, axis=1) >= thresh
            return jnp.where(conf, am, IGNORE_INDEX)
        return am

    cps = jnp.float32(0.0)
    for r in range(M):
        for l in range(r):
            Yl = pseudo(preds_U[..., l])
            Yr = pseudo(preds_U[..., r])
            cps = cps + ce(preds_U[..., l], Yr) + ce(preds_U[..., r], Yl)
    cps = jnp.where(jnp.isnan(cps), jnp.float32(0.0), cps)

    cel = jnp.float32(0.0)
    for j in range(M):
        cel = cel + ce(preds_L[..., j], targets)
    return ((cel + (trade_off_factor / (M - 1)) * cps) / M).reshape(1)


if __name__ == "__main__":
    key = jax.random.PRNGKey(0)
    k1, k2, k3 = jax.random.split(key, 3)

    N, C, H, W, M = 2, 4, 16, 16, 3   # HW = 256 -> padded to 1024 (8 sublane rows)
    preds_L = jax.random.normal(k1, (N, C, H, W, M), jnp.float32)
    preds_U = jax.random.normal(k2, (N, C, H, W, M), jnp.float32)
    targets = jax.random.randint(k3, (N, H, W), -1, C)   # -1 exercises ignore_index

    out = combined_cps_loss(targets, preds_L, preds_U)
    jax.block_until_ready(out)

    ref = _reference_loss(targets, preds_L, preds_U)
    assert out.shape == (1,) and bool(jnp.isfinite(out[0]))
    assert jnp.allclose(out, ref, rtol=5e-3, atol=1e-4), (out, ref)
    print("KERNEL_OK")
</pallas_src>

<mosaic_0001>
module attributes {stable_mosaic.version = 11 : i64} {
  func.func @_fused_loss_kernel(%arg0: i32, %arg1: i32, %arg2: memref<1x8x128xi32, #tpu.memory_space<vmem>>, %arg3: memref<3x1x4x8x128xf32, #tpu.memory_space<vmem>>, %arg4: memref<3x1x4x8x128xf32, #tpu.memory_space<vmem>>, %arg5: memref<1x11x8x128xf32, #tpu.memory_space<vmem>>) attributes {dimension_semantics = [#tpu.dimension_semantics<parallel>, #tpu.dimension_semantics<arbitrary>], iteration_bounds = array<i64: 2, 1>, scalar_prefetch = 0 : i64, scratch_operands = 0 : i64, tpu.core_type = #tpu.core_type<tc>, window_params = [{transform_indices = @transform_0, window_bounds = array<i64: 1, 8, 128>}, {transform_indices = @transform_1, window_bounds = array<i64: 3, 1, 4, 8, 128>}, {transform_indices = @transform_2, window_bounds = array<i64: 3, 1, 4, 8, 128>}, {transform_indices = @transform_3, window_bounds = array<i64: 1, 11, 8, 128>}]} {
    %c0_i32 = arith.constant 0 : i32
    %0 = arith.cmpi eq, %arg1, %c0_i32 : i32
    %1 = arith.extui %0 : i1 to i32
    %c0_i32_0 = arith.constant 0 : i32
    %2 = arith.cmpi ne, %1, %c0_i32_0 : i32
    scf.if %2 {
      %cst_199 = arith.constant 0.000000e+00 : f32
      %627 = vector.broadcast %cst_199 : f32 to vector<1x11x8x128xf32>
      %c0_200 = arith.constant 0 : index
      %c0_201 = arith.constant 0 : index
      %c0_202 = arith.constant 0 : index
      %c0_203 = arith.constant 0 : index
      %628 = vector.load %arg5[%c0_200, %c0_201, %c0_202, %c0_203] : memref<1x11x8x128xf32, #tpu.memory_space<vmem>>, vector<1x11x8x128xf32>
      tpu.vector_store %arg5[%c0_200, %c0_201, %c0_202, %c0_203], %627 {strides = array<i32>} : memref<1x11x8x128xf32, #tpu.memory_space<vmem>>, vector<1x11x8x128xf32>,
    } else {
    }
    %3 = tpu.iota {dimensions = array<i32: 0>} : vector<8x128xi32>
    %4 = tpu.iota {dimensions = array<i32: 1>} : vector<8x128xi32>
    %c8_i32 = arith.constant 8 : i32
    %5 = arith.muli %arg1, %c8_i32 : i32
    %6 = vector.broadcast %5 : i32 to vector<8x128xi32>
    %7 = arith.addi %6, %3 : vector<8x128xi32>
    %c128_i32 = arith.constant 128 : i32
    %8 = vector.broadcast %c128_i32 : i32 to vector<8x128xi32>
    %9 = arith.muli %7, %8 : vector<8x128xi32>
    %10 = arith.addi %9, %4 : vector<8x128xi32>
    %c256_i32 = arith.constant 256 : i32
    %11 = vector.broadcast %c256_i32 : i32 to vector<8x128xi32>
    %12 = arith.cmpi slt, %10, %11 : vector<8x128xi32>
    %c0 = arith.constant 0 : index
    %c0_1 = arith.constant 0 : index
    %c0_2 = arith.constant 0 : index
    %13 = vector.load %arg2[%c0, %c0_1, %c0_2] : memref<1x8x128xi32, #tpu.memory_space<vmem>>, vector<1x8x128xi32>
    %14 = vector.shape_cast %13 : vector<1x8x128xi32> to vector<8x128xi32>
    %c-1_i32 = arith.constant -1 : i32
    %15 = vector.broadcast %c-1_i32 : i32 to vector<8x128xi32>
    %16 = arith.cmpi ne, %14, %15 : vector<8x128xi32>
    %cst = arith.constant 0.000000e+00 : f32
    %17 = vector.broadcast %cst : f32 to vector<8x128xf32>
    %c0_3 = arith.constant 0 : index
    %c0_4 = arith.constant 0 : index
    %c0_5 = arith.constant 0 : index
    %c0_6 = arith.constant 0 : index
    %c0_7 = arith.constant 0 : index
    %18 = vector.load %arg3[%c0_3, %c0_4, %c0_5, %c0_6, %c0_7] : memref<3x1x4x8x128xf32, #tpu.memory_space<vmem>>, vector<1x1x4x8x128xf32>
    %19 = vector.shape_cast %18 : vector<1x1x4x8x128xf32> to vector<4x8x128xf32>
    %20 = vector.extract_strided_slice %19 {offsets = [0, 0, 0], sizes = [1, 8, 128], strides = [1, 1, 1]} : vector<4x8x128xf32> to vector<1x8x128xf32>
    %21 = vector.shape_cast %20 : vector<1x8x128xf32> to vector<8x128xf32>
    %22 = vector.extract_strided_slice %19 {offsets = [1, 0, 0], sizes = [1, 8, 128], strides = [1, 1, 1]} : vector<4x8x128xf32> to vector<1x8x128xf32>
    %23 = vector.shape_cast %22 : vector<1x8x128xf32> to vector<8x128xf32>
    %24 = arith.maximumf %21, %23 : vector<8x128xf32>
    %25 = vector.extract_strided_slice %19 {offsets = [2, 0, 0], sizes = [1, 8, 128], strides = [1, 1, 1]} : vector<4x8x128xf32> to vector<1x8x128xf32>
    %26 = vector.shape_cast %25 : vector<1x8x128xf32> to vector<8x128xf32>
    %27 = arith.maximumf %24, %26 : vector<8x128xf32>
    %28 = vector.extract_strided_slice %19 {offsets = [3, 0, 0], sizes = [1, 8, 128], strides = [1, 1, 1]} : vector<4x8x128xf32> to vector<1x8x128xf32>
    %29 = vector.shape_cast %28 : vector<1x8x128xf32> to vector<8x128xf32>
    %30 = arith.maximumf %27, %29 : vector<8x128xf32>
    %31 = vector.extract_strided_slice %19 {offsets = [0, 0, 0], sizes = [1, 8, 128], strides = [1, 1, 1]} : vector<4x8x128xf32> to vector<1x8x128xf32>
    %32 = vector.shape_cast %31 : vector<1x8x128xf32> to vector<8x128xf32>
    %33 = arith.subf %32, %30 : vector<8x128xf32>
    %34 = math.exp %33 : vector<8x128xf32>
    %35 = vector.extract_strided_slice %19 {offsets = [1, 0, 0], sizes = [1, 8, 128], strides = [1, 1, 1]} : vector<4x8x128xf32> to vector<1x8x128xf32>
    %36 = vector.shape_cast %35 : vector<1x8x128xf32> to vector<8x128xf32>
    %37 = arith.subf %36, %30 : vector<8x128xf32>
    %38 = math.exp %37 : vector<8x128xf32>
    %39 = arith.addf %34, %38 : vector<8x128xf32>
    %40 = vector.extract_strided_slice %19 {offsets = [2, 0, 0], sizes = [1, 8, 128], strides = [1, 1, 1]} : vector<4x8x128xf32> to vector<1x8x128xf32>
    %41 = vector.shape_cast %40 : vector<1x8x128xf32> to vector<8x128xf32>
    %42 = arith.subf %41, %30 : vector<8x128xf32>
    %43 = math.exp %42 : vector<8x128xf32>
    %44 = arith.addf %39, %43 : vector<8x128xf32>
    %45 = vector.extract_strided_slice %19 {offsets = [3, 0, 0], sizes = [1, 8, 128], strides = [1, 1, 1]} : vector<4x8x128xf32> to vector<1x8x128xf32>
    %46 = vector.shape_cast %45 : vector<1x8x128xf32> to vector<8x128xf32>
    %47 = arith.subf %46, %30 : vector<8x128xf32>
    %48 = math.exp %47 : vector<8x128xf32>
    %49 = arith.addf %44, %48 : vector<8x128xf32>
    %50 = math.log %49 : vector<8x128xf32>
    %51 = arith.addf %30, %50 : vector<8x128xf32>
    %c0_i32_8 = arith.constant 0 : i32
    %52 = vector.broadcast %c0_i32_8 : i32 to vector<8x128xi32>
    %53 = arith.select %16, %14, %52 : vector<8x128xi1>, vector<8x128xi32>
    %cst_9 = arith.constant 0.000000e+00 : f32
    %54 = vector.broadcast %cst_9 : f32 to vector<8x128xf32>
    %c0_i32_10 = arith.constant 0 : i32
    %55 = vector.broadcast %c0_i32_10 : i32 to vector<8x128xi32>
    %56 = arith.cmpi eq, %53, %55 : vector<8x128xi32>
    %57 = vector.extract_strided_slice %19 {offsets = [0, 0, 0], sizes = [1, 8, 128], strides = [1, 1, 1]} : vector<4x8x128xf32> to vector<1x8x128xf32>
    %58 = vector.shape_cast %57 : vector<1x8x128xf32> to vector<8x128xf32>
    %59 = arith.select %56, %58, %54 : vector<8x128xi1>, vector<8x128xf32>
    %c1_i32 = arith.constant 1 : i32
    %60 = vector.broadcast %c1_i32 : i32 to vector<8x128xi32>
    %61 = arith.cmpi eq, %53, %60 : vector<8x128xi32>
    %62 = vector.extract_strided_slice %19 {offsets = [1, 0, 0], sizes = [1, 8, 128], strides = [1, 1, 1]} : vector<4x8x128xf32> to vector<1x8x128xf32>
    %63 = vector.shape_cast %62 : vector<1x8x128xf32> to vector<8x128xf32>
    %64 = arith.select %61, %63, %59 : vector<8x128xi1>, vector<8x128xf32>
    %c2_i32 = arith.constant 2 : i32
    %65 = vector.broadcast %c2_i32 : i32 to vector<8x128xi32>
    %66 = arith.cmpi eq, %53, %65 : vector<8x128xi32>
    %67 = vector.extract_strided_slice %19 {offsets = [2, 0, 0], sizes = [1, 8, 128], strides = [1, 1, 1]} : vector<4x8x128xf32> to vector<1x8x128xf32>
    %68 = vector.shape_cast %67 : vector<1x8x128xf32> to vector<8x128xf32>
    %69 = arith.select %66, %68, %64 : vector<8x128xi1>, vector<8x128xf32>
    %c3_i32 = arith.constant 3 : i32
    %70 = vector.broadcast %c3_i32 : i32 to vector<8x128xi32>
    %71 = arith.cmpi eq, %53, %70 : vector<8x128xi32>
    %72 = vector.extract_strided_slice %19 {offsets = [3, 0, 0], sizes = [1, 8, 128], strides = [1, 1, 1]} : vector<4x8x128xf32> to vector<1x8x128xf32>
    %73 = vector.shape_cast %72 : vector<1x8x128xf32> to vector<8x128xf32>
    %74 = arith.select %71, %73, %69 : vector<8x128xi1>, vector<8x128xf32>
    %75 = arith.subf %51, %74 : vector<8x128xf32>
    %cst_11 = arith.constant 0.000000e+00 : f32
    %76 = vector.broadcast %cst_11 : f32 to vector<8x128xf32>
    %77 = arith.select %16, %75, %76 : vector<8x128xi1>, vector<8x128xf32>
    %78 = arith.addf %17, %77 : vector<8x128xf32>
    %c1 = arith.constant 1 : index
    %c0_12 = arith.constant 0 : index
    %c0_13 = arith.constant 0 : index
    %c0_14 = arith.constant 0 : index
    %c0_15 = arith.constant 0 : index
    %79 = vector.load %arg3[%c1, %c0_12, %c0_13, %c0_14, %c0_15] : memref<3x1x4x8x128xf32, #tpu.memory_space<vmem>>, vector<1x1x4x8x128xf32>
    %80 = vector.shape_cast %79 : vector<1x1x4x8x128xf32> to vector<4x8x128xf32>
    %81 = vector.extract_strided_slice %80 {offsets = [0, 0, 0], sizes = [1, 8, 128], strides = [1, 1, 1]} : vector<4x8x128xf32> to vector<1x8x128xf32>
    %82 = vector.shape_cast %81 : vector<1x8x128xf32> to vector<8x128xf32>
    %83 = vector.extract_strided_slice %80 {offsets = [1, 0, 0], sizes = [1, 8, 128], strides = [1, 1, 1]} : vector<4x8x128xf32> to vector<1x8x128xf32>
    %84 = vector.shape_cast %83 : vector<1x8x128xf32> to vector<8x128xf32>
    %85 = arith.maximumf %82, %84 : vector<8x128xf32>
    %86 = vector.extract_strided_slice %80 {offsets = [2, 0, 0], sizes = [1, 8, 128], strides = [1, 1, 1]} : vector<4x8x128xf32> to vector<1x8x128xf32>
    %87 = vector.shape_cast %86 : vector<1x8x128xf32> to vector<8x128xf32>
    %88 = arith.maximumf %85, %87 : vector<8x128xf32>
    %89 = vector.extract_strided_slice %80 {offsets = [3, 0, 0], sizes = [1, 8, 128], strides = [1, 1, 1]} : vector<4x8x128xf32> to vector<1x8x128xf32>
    %90 = vector.shape_cast %89 : vector<1x8x128xf32> to vector<8x128xf32>
    %91 = arith.maximumf %88, %90 : vector<8x128xf32>
    %92 = vector.extract_strided_slice %80 {offsets = [0, 0, 0], sizes = [1, 8, 128], strides = [1, 1, 1]} : vector<4x8x128xf32> to vector<1x8x128xf32>
    %93 = vector.shape_cast %92 : vector<1x8x128xf32> to vector<8x128xf32>
    %94 = arith.subf %93, %91 : vector<8x128xf32>
    %95 = math.exp %94 : vector<8x128xf32>
    %96 = vector.extract_strided_slice %80 {offsets = [1, 0, 0], sizes = [1, 8, 128], strides = [1, 1, 1]} : vector<4x8x128xf32> to vector<1x8x128xf32>
    %97 = vector.shape_cast %96 : vector<1x8x128xf32> to vector<8x128xf32>
    %98 = arith.subf %97, %91 : vector<8x128xf32>
    %99 = math.exp %98 : vector<8x128xf32>
    %100 = arith.addf %95, %99 : vector<8x128xf32>
    %101 = vector.extract_strided_slice %80 {offsets = [2, 0, 0], sizes = [1, 8, 128], strides = [1, 1, 1]} : vector<4x8x128xf32> to vector<1x8x128xf32>
    %102 = vector.shape_cast %101 : vector<1x8x128xf32> to vector<8x128xf32>
    %103 = arith.subf %102, %91 : vector<8x128xf32>
    %104 = math.exp %103 : vector<8x128xf32>
    %105 = arith.addf %100, %104 : vector<8x128xf32>
    %106 = vector.extract_strided_slice %80 {offsets = [3, 0, 0], sizes = [1, 8, 128], strides = [1, 1, 1]} : vector<4x8x128xf32> to vector<1x8x128xf32>
    %107 = vector.shape_cast %106 : vector<1x8x128xf32> to vector<8x128xf32>
    %108 = arith.subf %107, %91 : vector<8x128xf32>
    %109 = math.exp %108 : vector<8x128xf32>
    %110 = arith.addf %105, %109 : vector<8x128xf32>
    %111 = math.log %110 : vector<8x128xf32>
    %112 = arith.addf %91, %111 : vector<8x128xf32>
    %c0_i32_16 = arith.constant 0 : i32
    %113 = vector.broadcast %c0_i32_16 : i32 to vector<8x128xi32>
    %114 = arith.select %16, %14, %113 : vector<8x128xi1>, vector<8x128xi32>
    %cst_17 = arith.constant 0.000000e+00 : f32
    %115 = vector.broadcast %cst_17 : f32 to vector<8x128xf32>
    %c0_i32_18 = arith.constant 0 : i32
    %116 = vector.broadcast %c0_i32_18 : i32 to vector<8x128xi32>
    %117 = arith.cmpi eq, %114, %116 : vector<8x128xi32>
    %118 = vector.extract_strided_slice %80 {offsets = [0, 0, 0], sizes = [1, 8, 128], strides = [1, 1, 1]} : vector<4x8x128xf32> to vector<1x8x128xf32>
    %119 = vector.shape_cast %118 : vector<1x8x128xf32> to vector<8x128xf32>
    %120 = arith.select %117, %119, %115 : vector<8x128xi1>, vector<8x128xf32>
    %c1_i32_19 = arith.constant 1 : i32
    %121 = vector.broadcast %c1_i32_19 : i32 to vector<8x128xi32>
    %122 = arith.cmpi eq, %114, %121 : vector<8x128xi32>
    %123 = vector.extract_strided_slice %80 {offsets = [1, 0, 0], sizes = [1, 8, 128], strides = [1, 1, 1]} : vector<4x8x128xf32> to vector<1x8x128xf32>
    %124 = vector.shape_cast %123 : vector<1x8x128xf32> to vector<8x128xf32>
    %125 = arith.select %122, %124, %120 : vector<8x128xi1>, vector<8x128xf32>
    %c2_i32_20 = arith.constant 2 : i32
    %126 = vector.broadcast %c2_i32_20 : i32 to vector<8x128xi32>
    %127 = arith.cmpi eq, %114, %126 : vector<8x128xi32>
    %128 = vector.extract_strided_slice %80 {offsets = [2, 0, 0], sizes = [1, 8, 128], strides = [1, 1, 1]} : vector<4x8x128xf32> to vector<1x8x128xf32>
    %129 = vector.shape_cast %128 : vector<1x8x128xf32> to vector<8x128xf32>
    %130 = arith.select %127, %129, %125 : vector<8x128xi1>, vector<8x128xf32>
    %c3_i32_21 = arith.constant 3 : i32
    %131 = vector.broadcast %c3_i32_21 : i32 to vector<8x128xi32>
    %132 = arith.cmpi eq, %114, %131 : vector<8x128xi32>
    %133 = vector.extract_strided_slice %80 {offsets = [3, 0, 0], sizes = [1, 8, 128], strides = [1, 1, 1]} : vector<4x8x128xf32> to vector<1x8x128xf32>
    %134 = vector.shape_cast %133 : vector<1x8x128xf32> to vector<8x128xf32>
    %135 = arith.select %132, %134, %130 : vector<8x128xi1>, vector<8x128xf32>
    %136 = arith.subf %112, %135 : vector<8x128xf32>
    %cst_22 = arith.constant 0.000000e+00 : f32
    %137 = vector.broadcast %cst_22 : f32 to vector<8x128xf32>
    %138 = arith.select %16, %136, %137 : vector<8x128xi1>, vector<8x128xf32>
    %139 = arith.addf %78, %138 : vector<8x128xf32>
    %c2 = arith.constant 2 : index
    %c0_23 = arith.constant 0 : index
    %c0_24 = arith.constant 0 : index
    %c0_25 = arith.constant 0 : index
    %c0_26 = arith.constant 0 : index
    %140 = vector.load %arg3[%c2, %c0_23, %c0_24, %c0_25, %c0_26] : memref<3x1x4x8x128xf32, #tpu.memory_space<vmem>>, vector<1x1x4x8x128xf32>
    %141 = vector.shape_cast %140 : vector<1x1x4x8x128xf32> to vector<4x8x128xf32>
    %142 = vector.extract_strided_slice %141 {offsets = [0, 0, 0], sizes = [1, 8, 128], strides = [1, 1, 1]} : vector<4x8x128xf32> to vector<1x8x128xf32>
    %143 = vector.shape_cast %142 : vector<1x8x128xf32> to vector<8x128xf32>
    %144 = vector.extract_strided_slice %141 {offsets = [1, 0, 0], sizes = [1, 8, 128], strides = [1, 1, 1]} : vector<4x8x128xf32> to vector<1x8x128xf32>
    %145 = vector.shape_cast %144 : vector<1x8x128xf32> to vector<8x128xf32>
    %146 = arith.maximumf %143, %145 : vector<8x128xf32>
    %147 = vector.extract_strided_slice %141 {offsets = [2, 0, 0], sizes = [1, 8, 128], strides = [1, 1, 1]} : vector<4x8x128xf32> to vector<1x8x128xf32>
    %148 = vector.shape_cast %147 : vector<1x8x128xf32> to vector<8x128xf32>
    %149 = arith.maximumf %146, %148 : vector<8x128xf32>
    %150 = vector.extract_strided_slice %141 {offsets = [3, 0, 0], sizes = [1, 8, 128], strides = [1, 1, 1]} : vector<4x8x128xf32> to vector<1x8x128xf32>
    %151 = vector.shape_cast %150 : vector<1x8x128xf32> to vector<8x128xf32>
    %152 = arith.maximumf %149, %151 : vector<8x128xf32>
    %153 = vector.extract_strided_slice %141 {offsets = [0, 0, 0], sizes = [1, 8, 128], strides = [1, 1, 1]} : vector<4x8x128xf32> to vector<1x8x128xf32>
    %154 = vector.shape_cast %153 : vector<1x8x128xf32> to vector<8x128xf32>
    %155 = arith.subf %154, %152 : vector<8x128xf32>
    %156 = math.exp %155 : vector<8x128xf32>
    %157 = vector.extract_strided_slice %141 {offsets = [1, 0, 0], sizes = [1, 8, 128], strides = [1, 1, 1]} : vector<4x8x128xf32> to vector<1x8x128xf32>
    %158 = vector.shape_cast %157 : vector<1x8x128xf32> to vector<8x128xf32>
    %159 = arith.subf %158, %152 : vector<8x128xf32>
    %160 = math.exp %159 : vector<8x128xf32>
    %161 = arith.addf %156, %160 : vector<8x128xf32>
    %162 = vector.extract_strided_slice %141 {offsets = [2, 0, 0], sizes = [1, 8, 128], strides = [1, 1, 1]} : vector<4x8x128xf32> to vector<1x8x128xf32>
    %163 = vector.shape_cast %162 : vector<1x8x128xf32> to vector<8x128xf32>
    %164 = arith.subf %163, %152 : vector<8x128xf32>
    %165 = math.exp %164 : vector<8x128xf32>
    %166 = arith.addf %161, %165 : vector<8x128xf32>
    %167 = vector.extract_strided_slice %141 {offsets = [3, 0, 0], sizes = [1, 8, 128], strides = [1, 1, 1]} : vector<4x8x128xf32> to vector<1x8x128xf32>
    %168 = vector.shape_cast %167 : vector<1x8x128xf32> to vector<8x128xf32>
    %169 = arith.subf %168, %152 : vector<8x128xf32>
    %170 = math.exp %169 : vector<8x128xf32>
    %171 = arith.addf %166, %170 : vector<8x128xf32>
    %172 = math.log %171 : vector<8x128xf32>
    %173 = arith.addf %152, %172 : vector<8x128xf32>
    %c0_i32_27 = arith.constant 0 : i32
    %174 = vector.broadcast %c0_i32_27 : i32 to vector<8x128xi32>
    %175 = arith.select %16, %14, %174 : vector<8x128xi1>, vector<8x128xi32>
    %cst_28 = arith.constant 0.000000e+00 : f32
    %176 = vector.broadcast %cst_28 : f32 to vector<8x128xf32>
    %c0_i32_29 = arith.constant 0 : i32
    %177 = vector.broadcast %c0_i32_29 : i32 to vector<8x128xi32>
    %178 = arith.cmpi eq, %175, %177 : vector<8x128xi32>
    %179 = vector.extract_strided_slice %141 {offsets = [0, 0, 0], sizes = [1, 8, 128], strides = [1, 1, 1]} : vector<4x8x128xf32> to vector<1x8x128xf32>
    %180 = vector.shape_cast %179 : vector<1x8x128xf32> to vector<8x128xf32>
    %181 = arith.select %178, %180, %176 : vector<8x128xi1>, vector<8x128xf32>
    %c1_i32_30 = arith.constant 1 : i32
    %182 = vector.broadcast %c1_i32_30 : i32 to vector<8x128xi32>
    %183 = arith.cmpi eq, %175, %182 : vector<8x128xi32>
    %184 = vector.extract_strided_slice %141 {offsets = [1, 0, 0], sizes = [1, 8, 128], strides = [1, 1, 1]} : vector<4x8x128xf32> to vector<1x8x128xf32>
    %185 = vector.shape_cast %184 : vector<1x8x128xf32> to vector<8x128xf32>
    %186 = arith.select %183, %185, %181 : vector<8x128xi1>, vector<8x128xf32>
    %c2_i32_31 = arith.constant 2 : i32
    %187 = vector.broadcast %c2_i32_31 : i32 to vector<8x128xi32>
    %188 = arith.cmpi eq, %175, %187 : vector<8x128xi32>
    %189 = vector.extract_strided_slice %141 {offsets = [2, 0, 0], sizes = [1, 8, 128], strides = [1, 1, 1]} : vector<4x8x128xf32> to vector<1x8x128xf32>
    %190 = vector.shape_cast %189 : vector<1x8x128xf32> to vector<8x128xf32>
    %191 = arith.select %188, %190, %186 : vector<8x128xi1>, vector<8x128xf32>
    %c3_i32_32 = arith.constant 3 : i32
    %192 = vector.broadcast %c3_i32_32 : i32 to vector<8x128xi32>
    %193 = arith.cmpi eq, %175, %192 : vector<8x128xi32>
    %194 = vector.extract_strided_slice %141 {offsets = [3, 0, 0], sizes = [1, 8, 128], strides = [1, 1, 1]} : vector<4x8x128xf32> to vector<1x8x128xf32>
    %195 = vector.shape_cast %194 : vector<1x8x128xf32> to vector<8x128xf32>
    %196 = arith.select %193, %195, %191 : vector<8x128xi1>, vector<8x128xf32>
    %197 = arith.subf %173, %196 : vector<8x128xf32>
    %cst_33 = arith.constant 0.000000e+00 : f32
    %198 = vector.broadcast %cst_33 : f32 to vector<8x128xf32>
    %199 = arith.select %16, %197, %198 : vector<8x128xi1>, vector<8x128xf32>
    %200 = arith.addf %139, %199 : vector<8x128xf32>
    %c0_34 = arith.constant 0 : index
    %c0_35 = arith.constant 0 : index
    %c0_36 = arith.constant 0 : index
    %c0_37 = arith.constant 0 : index
    %201 = vector.load %arg5[%c0_34, %c0_35, %c0_36, %c0_37] : memref<1x11x8x128xf32, #tpu.memory_space<vmem>>, vector<1x1x8x128xf32>
    %202 = vector.shape_cast %201 : vector<1x1x8x128xf32> to vector<8x128xf32>
    %203 = vector.shape_cast %200 : vector<8x128xf32> to vector<1x8x128xf32>
    %cst_38 = arith.constant dense<0.000000e+00> : vector<8x128xf32>
    %204 = vector.multi_reduction <add>, %203, %cst_38 [0] : vector<1x8x128xf32> to vector<8x128xf32>
    %205 = arith.addf %202, %204 : vector<8x128xf32>
    %c0_39 = arith.constant 0 : index
    %c0_40 = arith.constant 0 : index
    %c0_41 = arith.constant 0 : index
    %c0_42 = arith.constant 0 : index
    %206 = vector.load %arg5[%c0_39, %c0_40, %c0_41, %c0_42] : memref<1x11x8x128xf32, #tpu.memory_space<vmem>>, vector<1x1x8x128xf32>
    %207 = vector.shape_cast %206 : vector<1x1x8x128xf32> to vector<8x128xf32>
    %208 = vector.shape_cast %205 : vector<8x128xf32> to vector<1x1x8x128xf32>
    tpu.vector_store %arg5[%c0_39, %c0_40, %c0_41, %c0_42], %208 {strides = array<i32>} : memref<1x11x8x128xf32, #tpu.memory_space<vmem>>, vector<1x1x8x128xf32>,
    %209 = arith.extui %16 : vector<8x128xi1> to vector<8x128xi32>
    %210 = arith.sitofp %209 : vector<8x128xi32> to vector<8x128xf32>
    %c0_43 = arith.constant 0 : index
    %c1_44 = arith.constant 1 : index
    %c0_45 = arith.constant 0 : index
    %c0_46 = arith.constant 0 : index
    %211 = vector.load %arg5[%c0_43, %c1_44, %c0_45, %c0_46] : memref<1x11x8x128xf32, #tpu.memory_space<vmem>>, vector<1x1x8x128xf32>
    %212 = vector.shape_cast %211 : vector<1x1x8x128xf32> to vector<8x128xf32>
    %213 = vector.shape_cast %210 : vector<8x128xf32> to vector<1x8x128xf32>
    %cst_47 = arith.constant dense<0.000000e+00> : vector<8x128xf32>
    %214 = vector.multi_reduction <add>, %213, %cst_47 [0] : vector<1x8x128xf32> to vector<8x128xf32>
    %215 = arith.addf %212, %214 : vector<8x128xf32>
    %c0_48 = arith.constant 0 : index
    %c1_49 = arith.constant 1 : index
    %c0_50 = arith.constant 0 : index
    %c0_51 = arith.constant 0 : index
    %216 = vector.load %arg5[%c0_48, %c1_49, %c0_50, %c0_51] : memref<1x11x8x128xf32, #tpu.memory_space<vmem>>, vector<1x1x8x128xf32>
    %217 = vector.shape_cast %216 : vector<1x1x8x128xf32> to vector<8x128xf32>
    %218 = vector.shape_cast %215 : vector<8x128xf32> to vector<1x1x8x128xf32>
    tpu.vector_store %arg5[%c0_48, %c1_49, %c0_50, %c0_51], %218 {strides = array<i32>} : memref<1x11x8x128xf32, #tpu.memory_space<vmem>>, vector<1x1x8x128xf32>,
    %c0_52 = arith.constant 0 : index
    %c0_53 = arith.constant 0 : index
    %c0_54 = arith.constant 0 : index
    %c0_55 = arith.constant 0 : index
    %c0_56 = arith.constant 0 : index
    %219 = vector.load %arg4[%c0_52, %c0_53, %c0_54, %c0_55, %c0_56] : memref<3x1x4x8x128xf32, #tpu.memory_space<vmem>>, vector<1x1x4x8x128xf32>
    %220 = vector.shape_cast %219 : vector<1x1x4x8x128xf32> to vector<4x8x128xf32>
    %c1_57 = arith.constant 1 : index
    %c0_58 = arith.constant 0 : index
    %c0_59 = arith.constant 0 : index
    %c0_60 = arith.constant 0 : index
    %c0_61 = arith.constant 0 : index
    %221 = vector.load %arg4[%c1_57, %c0_58, %c0_59, %c0_60, %c0_61] : memref<3x1x4x8x128xf32, #tpu.memory_space<vmem>>, vector<1x1x4x8x128xf32>
    %222 = vector.shape_cast %221 : vector<1x1x4x8x128xf32> to vector<4x8x128xf32>
    %c2_62 = arith.constant 2 : index
    %c0_63 = arith.constant 0 : index
    %c0_64 = arith.constant 0 : index
    %c0_65 = arith.constant 0 : index
    %c0_66 = arith.constant 0 : index
    %223 = vector.load %arg4[%c2_62, %c0_63, %c0_64, %c0_65, %c0_66] : memref<3x1x4x8x128xf32, #tpu.memory_space<vmem>>, vector<1x1x4x8x128xf32>
    %224 = vector.shape_cast %223 : vector<1x1x4x8x128xf32> to vector<4x8x128xf32>
    %225 = vector.extract_strided_slice %220 {offsets = [0, 0, 0], sizes = [1, 8, 128], strides = [1, 1, 1]} : vector<4x8x128xf32> to vector<1x8x128xf32>
    %226 = vector.shape_cast %225 : vector<1x8x128xf32> to vector<8x128xf32>
    %227 = vector.extract_strided_slice %220 {offsets = [1, 0, 0], sizes = [1, 8, 128], strides = [1, 1, 1]} : vector<4x8x128xf32> to vector<1x8x128xf32>
    %228 = vector.shape_cast %227 : vector<1x8x128xf32> to vector<8x128xf32>
    %229 = arith.maximumf %226, %228 : vector<8x128xf32>
    %230 = vector.extract_strided_slice %220 {offsets = [2, 0, 0], sizes = [1, 8, 128], strides = [1, 1, 1]} : vector<4x8x128xf32> to vector<1x8x128xf32>
    %231 = vector.shape_cast %230 : vector<1x8x128xf32> to vector<8x128xf32>
    %232 = arith.maximumf %229, %231 : vector<8x128xf32>
    %233 = vector.extract_strided_slice %220 {offsets = [3, 0, 0], sizes = [1, 8, 128], strides = [1, 1, 1]} : vector<4x8x128xf32> to vector<1x8x128xf32>
    %234 = vector.shape_cast %233 : vector<1x8x128xf32> to vector<8x128xf32>
    %235 = arith.maximumf %232, %234 : vector<8x128xf32>
    %236 = vector.extract_strided_slice %220 {offsets = [0, 0, 0], sizes = [1, 8, 128], strides = [1, 1, 1]} : vector<4x8x128xf32> to vector<1x8x128xf32>
    %237 = vector.shape_cast %236 : vector<1x8x128xf32> to vector<8x128xf32>
    %238 = arith.subf %237, %235 : vector<8x128xf32>
    %239 = math.exp %238 : vector<8x128xf32>
    %240 = vector.extract_strided_slice %220 {offsets = [1, 0, 0], sizes = [1, 8, 128], strides = [1, 1, 1]} : vector<4x8x128xf32> to vector<1x8x128xf32>
    %241 = vector.shape_cast %240 : vector<1x8x128xf32> to vector<8x128xf32>
    %242 = arith.subf %241, %235 : vector<8x128xf32>
    %243 = math.exp %242 : vector<8x128xf32>
    %244 = arith.addf %239, %243 : vector<8x128xf32>
    %245 = vector.extract_strided_slice %220 {offsets = [2, 0, 0], sizes = [1, 8, 128], strides = [1, 1, 1]} : vector<4x8x128xf32> to vector<1x8x128xf32>
    %246 = vector.shape_cast %245 : vector<1x8x128xf32> to vector<8x128xf32>
    %247 = arith.subf %246, %235 : vector<8x128xf32>
    %248 = math.exp %247 : vector<8x128xf32>
    %249 = arith.addf %244, %248 : vector<8x128xf32>
    %250 = vector.extract_strided_slice %220 {offsets = [3, 0, 0], sizes = [1, 8, 128], strides = [1, 1, 1]} : vector<4x8x128xf32> to vector<1x8x128xf32>
    %251 = vector.shape_cast %250 : vector<1x8x128xf32> to vector<8x128xf32>
    %252 = arith.subf %251, %235 : vector<8x128xf32>
    %253 = math.exp %252 : vector<8x128xf32>
    %254 = arith.addf %249, %253 : vector<8x128xf32>
    %255 = math.log %254 : vector<8x128xf32>
    %256 = arith.addf %235, %255 : vector<8x128xf32>
    %c4_i32 = arith.constant 4 : i32
    %257 = vector.broadcast %c4_i32 : i32 to vector<8x128xi32>
    %258 = vector.extract_strided_slice %220 {offsets = [3, 0, 0], sizes = [1, 8, 128], strides = [1, 1, 1]} : vector<4x8x128xf32> to vector<1x8x128xf32>
    %259 = vector.shape_cast %258 : vector<1x8x128xf32> to vector<8x128xf32>
    %260 = arith.cmpf oeq, %259, %235 : vector<8x128xf32>
    %c3_i32_67 = arith.constant 3 : i32
    %261 = vector.broadcast %c3_i32_67 : i32 to vector<8x128xi32>
    %262 = arith.select %260, %261, %257 : vector<8x128xi1>, vector<8x128xi32>
    %263 = vector.extract_strided_slice %220 {offsets = [2, 0, 0], sizes = [1, 8, 128], strides = [1, 1, 1]} : vector<4x8x128xf32> to vector<1x8x128xf32>
    %264 = vector.shape_cast %263 : vector<1x8x128xf32> to vector<8x128xf32>
    %265 = arith.cmpf oeq, %264, %235 : vector<8x128xf32>
    %c2_i32_68 = arith.constant 2 : i32
    %266 = vector.broadcast %c2_i32_68 : i32 to vector<8x128xi32>
    %267 = arith.select %265, %266, %262 : vector<8x128xi1>, vector<8x128xi32>
    %268 = vector.extract_strided_slice %220 {offsets = [1, 0, 0], sizes = [1, 8, 128], strides = [1, 1, 1]} : vector<4x8x128xf32> to vector<1x8x128xf32>
    %269 = vector.shape_cast %268 : vector<1x8x128xf32> to vector<8x128xf32>
    %270 = arith.cmpf oeq, %269, %235 : vector<8x128xf32>
    %c1_i32_69 = arith.constant 1 : i32
    %271 = vector.broadcast %c1_i32_69 : i32 to vector<8x128xi32>
    %272 = arith.select %270, %271, %267 : vector<8x128xi1>, vector<8x128xi32>
    %273 = vector.extract_strided_slice %220 {offsets = [0, 0, 0], sizes = [1, 8, 128], strides = [1, 1, 1]} : vector<4x8x128xf32> to vector<1x8x128xf32>
    %274 = vector.shape_cast %273 : vector<1x8x128xf32> to vector<8x128xf32>
    %275 = arith.cmpf oeq, %274, %235 : vector<8x128xf32>
    %c0_i32_70 = arith.constant 0 : i32
    %276 = vector.broadcast %c0_i32_70 : i32 to vector<8x128xi32>
    %277 = arith.select %275, %276, %272 : vector<8x128xi1>, vector<8x128xi32>
    %cst_71 = arith.constant 1.42857146 : f32
    %278 = vector.broadcast %cst_71 : f32 to vector<8x128xf32>
    %279 = arith.cmpf ole, %254, %278 : vector<8x128xf32>
    %280 = arith.andi %279, %12 : vector<8x128xi1>
    %281 = arith.extui %280 : vector<8x128xi1> to vector<8x128xi32>
    %282 = arith.sitofp %281 : vector<8x128xi32> to vector<8x128xf32>
    %c0_72 = arith.constant 0 : index
    %c2_73 = arith.constant 2 : index
    %c0_74 = arith.constant 0 : index
    %c0_75 = arith.constant 0 : index
    %283 = vector.load %arg5[%c0_72, %c2_73, %c0_74, %c0_75] : memref<1x11x8x128xf32, #tpu.memory_space<vmem>>, vector<1x1x8x128xf32>
    %284 = vector.shape_cast %283 : vector<1x1x8x128xf32> to vector<8x128xf32>
    %285 = vector.shape_cast %282 : vector<8x128xf32> to vector<1x8x128xf32>
    %cst_76 = arith.constant dense<0.000000e+00> : vector<8x128xf32>
    %286 = vector.multi_reduction <add>, %285, %cst_76 [0] : vector<1x8x128xf32> to vector<8x128xf32>
    %287 = arith.addf %284, %286 : vector<8x128xf32>
    %c0_77 = arith.constant 0 : index
    %c2_78 = arith.constant 2 : index
    %c0_79 = arith.constant 0 : index
    %c0_80 = arith.constant 0 : index
    %288 = vector.load %arg5[%c0_77, %c2_78, %c0_79, %c0_80] : memref<1x11x8x128xf32, #tpu.memory_space<vmem>>, vector<1x1x8x128xf32>
    %289 = vector.shape_cast %288 : vector<1x1x8x128xf32> to vector<8x128xf32>
    %290 = vector.shape_cast %287 : vector<8x128xf32> to vector<1x1x8x128xf32>
    tpu.vector_store %arg5[%c0_77, %c2_78, %c0_79, %c0_80], %290 {strides = array<i32>} : memref<1x11x8x128xf32, #tpu.memory_space<vmem>>, vector<1x1x8x128xf32>,
    %291 = vector.extract_strided_slice %222 {offsets = [0, 0, 0], sizes = [1, 8, 128], strides = [1, 1, 1]} : vector<4x8x128xf32> to vector<1x8x128xf32>
    %292 = vector.shape_cast %291 : vector<1x8x128xf32> to vector<8x128xf32>
    %293 = vector.extract_strided_slice %222 {offsets = [1, 0, 0], sizes = [1, 8, 128], strides = [1, 1, 1]} : vector<4x8x128xf32> to vector<1x8x128xf32>
    %294 = vector.shape_cast %293 : vector<1x8x128xf32> to vector<8x128xf32>
    %295 = arith.maximumf %292, %294 : vector<8x128xf32>
    %296 = vector.extract_strided_slice %222 {offsets = [2, 0, 0], sizes = [1, 8, 128], strides = [1, 1, 1]} : vector<4x8x128xf32> to vector<1x8x128xf32>
    %297 = vector.shape_cast %296 : vector<1x8x128xf32> to vector<8x128xf32>
    %298 = arith.maximumf %295, %297 : vector<8x128xf32>
    %299 = vector.extract_strided_slice %222 {offsets = [3, 0, 0], sizes = [1, 8, 128], strides = [1, 1, 1]} : vector<4x8x128xf32> to vector<1x8x128xf32>
    %300 = vector.shape_cast %299 : vector<1x8x128xf32> to vector<8x128xf32>
    %301 = arith.maximumf %298, %300 : vector<8x128xf32>
    %302 = vector.extract_strided_slice %222 {offsets = [0, 0, 0], sizes = [1, 8, 128], strides = [1, 1, 1]} : vector<4x8x128xf32> to vector<1x8x128xf32>
    %303 = vector.shape_cast %302 : vector<1x8x128xf32> to vector<8x128xf32>
    %304 = arith.subf %303, %301 : vector<8x128xf32>
    %305 = math.exp %304 : vector<8x128xf32>
    %306 = vector.extract_strided_slice %222 {offsets = [1, 0, 0], sizes = [1, 8, 128], strides = [1, 1, 1]} : vector<4x8x128xf32> to vector<1x8x128xf32>
    %307 = vector.shape_cast %306 : vector<1x8x128xf32> to vector<8x128xf32>
    %308 = arith.subf %307, %301 : vector<8x128xf32>
    %309 = math.exp %308 : vector<8x128xf32>
    %310 = arith.addf %305, %309 : vector<8x128xf32>
    %311 = vector.extract_strided_slice %222 {offsets = [2, 0, 0], sizes = [1, 8, 128], strides = [1, 1, 1]} : vector<4x8x128xf32> to vector<1x8x128xf32>
    %312 = vector.shape_cast %311 : vector<1x8x128xf32> to vector<8x128xf32>
    %313 = arith.subf %312, %301 : vector<8x128xf32>
    %314 = math.exp %313 : vector<8x128xf32>
    %315 = arith.addf %310, %314 : vector<8x128xf32>
    %316 = vector.extract_strided_slice %222 {offsets = [3, 0, 0], sizes = [1, 8, 128], strides = [1, 1, 1]} : vector<4x8x128xf32> to vector<1x8x128xf32>
    %317 = vector.shape_cast %316 : vector<1x8x128xf32> to vector<8x128xf32>
    %318 = arith.subf %317, %301 : vector<8x128xf32>
    %319 = math.exp %318 : vector<8x128xf32>
    %320 = arith.addf %315, %319 : vector<8x128xf32>
    %321 = math.log %320 : vector<8x128xf32>
    %322 = arith.addf %301, %321 : vector<8x128xf32>
    %c4_i32_81 = arith.constant 4 : i32
    %323 = vector.broadcast %c4_i32_81 : i32 to vector<8x128xi32>
    %324 = vector.extract_strided_slice %222 {offsets = [3, 0, 0], sizes = [1, 8, 128], strides = [1, 1, 1]} : vector<4x8x128xf32> to vector<1x8x128xf32>
    %325 = vector.shape_cast %324 : vector<1x8x128xf32> to vector<8x128xf32>
    %326 = arith.cmpf oeq, %325, %301 : vector<8x128xf32>
    %c3_i32_82 = arith.constant 3 : i32
    %327 = vector.broadcast %c3_i32_82 : i32 to vector<8x128xi32>
    %328 = arith.select %326, %327, %323 : vector<8x128xi1>, vector<8x128xi32>
    %329 = vector.extract_strided_slice %222 {offsets = [2, 0, 0], sizes = [1, 8, 128], strides = [1, 1, 1]} : vector<4x8x128xf32> to vector<1x8x128xf32>
    %330 = vector.shape_cast %329 : vector<1x8x128xf32> to vector<8x128xf32>
    %331 = arith.cmpf oeq, %330, %301 : vector<8x128xf32>
    %c2_i32_83 = arith.constant 2 : i32
    %332 = vector.broadcast %c2_i32_83 : i32 to vector<8x128xi32>
    %333 = arith.select %331, %332, %328 : vector<8x128xi1>, vector<8x128xi32>
    %334 = vector.extract_strided_slice %222 {offsets = [1, 0, 0], sizes = [1, 8, 128], strides = [1, 1, 1]} : vector<4x8x128xf32> to vector<1x8x128xf32>
    %335 = vector.shape_cast %334 : vector<1x8x128xf32> to vector<8x128xf32>
    %336 = arith.cmpf oeq, %335, %301 : vector<8x128xf32>
    %c1_i32_84 = arith.constant 1 : i32
    %337 = vector.broadcast %c1_i32_84 : i32 to vector<8x128xi32>
    %338 = arith.select %336, %337, %333 : vector<8x128xi1>, vector<8x128xi32>
    %339 = vector.extract_strided_slice %222 {offsets = [0, 0, 0], sizes = [1, 8, 128], strides = [1, 1, 1]} : vector<4x8x128xf32> to vector<1x8x128xf32>
    %340 = vector.shape_cast %339 : vector<1x8x128xf32> to vector<8x128xf32>
    %341 = arith.cmpf oeq, %340, %301 : vector<8x128xf32>
    %c0_i32_85 = arith.constant 0 : i32
    %342 = vector.broadcast %c0_i32_85 : i32 to vector<8x128xi32>
    %343 = arith.select %341, %342, %338 : vector<8x128xi1>, vector<8x128xi32>
    %cst_86 = arith.constant 1.42857146 : f32
    %344 = vector.broadcast %cst_86 : f32 to vector<8x128xf32>
    %345 = arith.cmpf ole, %320, %344 : vector<8x128xf32>
    %346 = arith.andi %345, %12 : vector<8x128xi1>
    %347 = arith.extui %346 : vector<8x128xi1> to vector<8x128xi32>
    %348 = arith.sitofp %347 : vector<8x128xi32> to vector<8x128xf32>
    %c0_87 = arith.constant 0 : index
    %c3 = arith.constant 3 : index
    %c0_88 = arith.constant 0 : index
    %c0_89 = arith.constant 0 : index
    %349 = vector.load %arg5[%c0_87, %c3, %c0_88, %c0_89] : memref<1x11x8x128xf32, #tpu.memory_space<vmem>>, vector<1x1x8x128xf32>
    %350 = vector.shape_cast %349 : vector<1x1x8x128xf32> to vector<8x128xf32>
    %351 = vector.shape_cast %348 : vector<8x128xf32> to vector<1x8x128xf32>
    %cst_90 = arith.constant dense<0.000000e+00> : vector<8x128xf32>
    %352 = vector.multi_reduction <add>, %351, %cst_90 [0] : vector<1x8x128xf32> to vector<8x128xf32>
    %353 = arith.addf %350, %352 : vector<8x128xf32>
    %c0_91 = arith.constant 0 : index
    %c3_92 = arith.constant 3 : index
    %c0_93 = arith.constant 0 : index
    %c0_94 = arith.constant 0 : index
    %354 = vector.load %arg5[%c0_91, %c3_92, %c0_93, %c0_94] : memref<1x11x8x128xf32, #tpu.memory_space<vmem>>, vector<1x1x8x128xf32>
    %355 = vector.shape_cast %354 : vector<1x1x8x128xf32> to vector<8x128xf32>
    %356 = vector.shape_cast %353 : vector<8x128xf32> to vector<1x1x8x128xf32>
    tpu.vector_store %arg5[%c0_91, %c3_92, %c0_93, %c0_94], %356 {strides = array<i32>} : memref<1x11x8x128xf32, #tpu.memory_space<vmem>>, vector<1x1x8x128xf32>,
    %357 = vector.extract_strided_slice %224 {offsets = [0, 0, 0], sizes = [1, 8, 128], strides = [1, 1, 1]} : vector<4x8x128xf32> to vector<1x8x128xf32>
    %358 = vector.shape_cast %357 : vector<1x8x128xf32> to vector<8x128xf32>
    %359 = vector.extract_strided_slice %224 {offsets = [1, 0, 0], sizes = [1, 8, 128], strides = [1, 1, 1]} : vector<4x8x128xf32> to vector<1x8x128xf32>
    %360 = vector.shape_cast %359 : vector<1x8x128xf32> to vector<8x128xf32>
    %361 = arith.maximumf %358, %360 : vector<8x128xf32>
    %362 = vector.extract_strided_slice %224 {offsets = [2, 0, 0], sizes = [1, 8, 128], strides = [1, 1, 1]} : vector<4x8x128xf32> to vector<1x8x128xf32>
    %363 = vector.shape_cast %362 : vector<1x8x128xf32> to vector<8x128xf32>
    %364 = arith.maximumf %361, %363 : vector<8x128xf32>
    %365 = vector.extract_strided_slice %224 {offsets = [3, 0, 0], sizes = [1, 8, 128], strides = [1, 1, 1]} : vector<4x8x128xf32> to vector<1x8x128xf32>
    %366 = vector.shape_cast %365 : vector<1x8x128xf32> to vector<8x128xf32>
    %367 = arith.maximumf %364, %366 : vector<8x128xf32>
    %368 = vector.extract_strided_slice %224 {offsets = [0, 0, 0], sizes = [1, 8, 128], strides = [1, 1, 1]} : vector<4x8x128xf32> to vector<1x8x128xf32>
    %369 = vector.shape_cast %368 : vector<1x8x128xf32> to vector<8x128xf32>
    %370 = arith.subf %369, %367 : vector<8x128xf32>
    %371 = math.exp %370 : vector<8x128xf32>
    %372 = vector.extract_strided_slice %224 {offsets = [1, 0, 0], sizes = [1, 8, 128], strides = [1, 1, 1]} : vector<4x8x128xf32> to vector<1x8x128xf32>
    %373 = vector.shape_cast %372 : vector<1x8x128xf32> to vector<8x128xf32>
    %374 = arith.subf %373, %367 : vector<8x128xf32>
    %375 = math.exp %374 : vector<8x128xf32>
    %376 = arith.addf %371, %375 : vector<8x128xf32>
    %377 = vector.extract_strided_slice %224 {offsets = [2, 0, 0], sizes = [1, 8, 128], strides = [1, 1, 1]} : vector<4x8x128xf32> to vector<1x8x128xf32>
    %378 = vector.shape_cast %377 : vector<1x8x128xf32> to vector<8x128xf32>
    %379 = arith.subf %378, %367 : vector<8x128xf32>
    %380 = math.exp %379 : vector<8x128xf32>
    %381 = arith.addf %376, %380 : vector<8x128xf32>
    %382 = vector.extract_strided_slice %224 {offsets = [3, 0, 0], sizes = [1, 8, 128], strides = [1, 1, 1]} : vector<4x8x128xf32> to vector<1x8x128xf32>
    %383 = vector.shape_cast %382 : vector<1x8x128xf32> to vector<8x128xf32>
    %384 = arith.subf %383, %367 : vector<8x128xf32>
    %385 = math.exp %384 : vector<8x128xf32>
    %386 = arith.addf %381, %385 : vector<8x128xf32>
    %387 = math.log %386 : vector<8x128xf32>
    %388 = arith.addf %367, %387 : vector<8x128xf32>
    %c4_i32_95 = arith.constant 4 : i32
    %389 = vector.broadcast %c4_i32_95 : i32 to vector<8x128xi32>
    %390 = vector.extract_strided_slice %224 {offsets = [3, 0, 0], sizes = [1, 8, 128], strides = [1, 1, 1]} : vector<4x8x128xf32> to vector<1x8x128xf32>
    %391 = vector.shape_cast %390 : vector<1x8x128xf32> to vector<8x128xf32>
    %392 = arith.cmpf oeq, %391, %367 : vector<8x128xf32>
    %c3_i32_96 = arith.constant 3 : i32
    %393 = vector.broadcast %c3_i32_96 : i32 to vector<8x128xi32>
    %394 = arith.select %392, %393, %389 : vector<8x128xi1>, vector<8x128xi32>
    %395 = vector.extract_strided_slice %224 {offsets = [2, 0, 0], sizes = [1, 8, 128], strides = [1, 1, 1]} : vector<4x8x128xf32> to vector<1x8x128xf32>
    %396 = vector.shape_cast %395 : vector<1x8x128xf32> to vector<8x128xf32>
    %397 = arith.cmpf oeq, %396, %367 : vector<8x128xf32>
    %c2_i32_97 = arith.constant 2 : i32
    %398 = vector.broadcast %c2_i32_97 : i32 to vector<8x128xi32>
    %399 = arith.select %397, %398, %394 : vector<8x128xi1>, vector<8x128xi32>
    %400 = vector.extract_strided_slice %224 {offsets = [1, 0, 0], sizes = [1, 8, 128], strides = [1, 1, 1]} : vector<4x8x128xf32> to vector<1x8x128xf32>
    %401 = vector.shape_cast %400 : vector<1x8x128xf32> to vector<8x128xf32>
    %402 = arith.cmpf oeq, %401, %367 : vector<8x128xf32>
    %c1_i32_98 = arith.constant 1 : i32
    %403 = vector.broadcast %c1_i32_98 : i32 to vector<8x128xi32>
    %404 = arith.select %402, %403, %399 : vector<8x128xi1>, vector<8x128xi32>
    %405 = vector.extract_strided_slice %224 {offsets = [0, 0, 0], sizes = [1, 8, 128], strides = [1, 1, 1]} : vector<4x8x128xf32> to vector<1x8x128xf32>
    %406 = vector.shape_cast %405 : vector<1x8x128xf32> to vector<8x128xf32>
    %407 = arith.cmpf oeq, %406, %367 : vector<8x128xf32>
    %c0_i32_99 = arith.constant 0 : i32
    %408 = vector.broadcast %c0_i32_99 : i32 to vector<8x128xi32>
    %409 = arith.select %407, %408, %404 : vector<8x128xi1>, vector<8x128xi32>
    %cst_100 = arith.constant 1.42857146 : f32
    %410 = vector.broadcast %cst_100 : f32 to vector<8x128xf32>
    %411 = arith.cmpf ole, %386, %410 : vector<8x128xf32>
    %412 = arith.andi %411, %12 : vector<8x128xi1>
    %413 = arith.extui %412 : vector<8x128xi1> to vector<8x128xi32>
    %414 = arith.sitofp %413 : vector<8x128xi32> to vector<8x128xf32>
    %c0_101 = arith.constant 0 : index
    %c4 = arith.constant 4 : index
    %c0_102 = arith.constant 0 : index
    %c0_103 = arith.constant 0 : index
    %415 = vector.load %arg5[%c0_101, %c4, %c0_102, %c0_103] : memref<1x11x8x128xf32, #tpu.memory_space<vmem>>, vector<1x1x8x128xf32>
    %416 = vector.shape_cast %415 : vector<1x1x8x128xf32> to vector<8x128xf32>
    %417 = vector.shape_cast %414 : vector<8x128xf32> to vector<1x8x128xf32>
    %cst_104 = arith.constant dense<0.000000e+00> : vector<8x128xf32>
    %418 = vector.multi_reduction <add>, %417, %cst_104 [0] : vector<1x8x128xf32> to vector<8x128xf32>
    %419 = arith.addf %416, %418 : vector<8x128xf32>
    %c0_105 = arith.constant 0 : index
    %c4_106 = arith.constant 4 : index
    %c0_107 = arith.constant 0 : index
    %c0_108 = arith.constant 0 : index
    %420 = vector.load %arg5[%c0_105, %c4_106, %c0_107, %c0_108] : memref<1x11x8x128xf32, #tpu.memory_space<vmem>>, vector<1x1x8x128xf32>
    %421 = vector.shape_cast %420 : vector<1x1x8x128xf32> to vector<8x128xf32>
    %422 = vector.shape_cast %419 : vector<8x128xf32> to vector<1x1x8x128xf32>
    tpu.vector_store %arg5[%c0_105, %c4_106, %c0_107, %c0_108], %422 {strides = array<i32>} : memref<1x11x8x128xf32, #tpu.memory_space<vmem>>, vector<1x1x8x128xf32>,
    %c0_i32_109 = arith.constant 0 : i32
    %423 = vector.broadcast %c0_i32_109 : i32 to vector<8x128xi32>
    %424 = arith.select %346, %343, %423 : vector<8x128xi1>, vector<8x128xi32>
    %cst_110 = arith.constant 0.000000e+00 : f32
    %425 = vector.broadcast %cst_110 : f32 to vector<8x128xf32>
    %c0_i32_111 = arith.constant 0 : i32
    %426 = vector.broadcast %c0_i32_111 : i32 to vector<8x128xi32>
    %427 = arith.cmpi eq, %424, %426 : vector<8x128xi32>
    %428 = vector.extract_strided_slice %220 {offsets = [0, 0, 0], sizes = [1, 8, 128], strides = [1, 1, 1]} : vector<4x8x128xf32> to vector<1x8x128xf32>
    %429 = vector.shape_cast %428 : vector<1x8x128xf32> to vector<8x128xf32>
    %430 = arith.select %427, %429, %425 : vector<8x128xi1>, vector<8x128xf32>
    %c1_i32_112 = arith.constant 1 : i32
    %431 = vector.broadcast %c1_i32_112 : i32 to vector<8x128xi32>
    %432 = arith.cmpi eq, %424, %431 : vector<8x128xi32>
    %433 = vector.extract_strided_slice %220 {offsets = [1, 0, 0], sizes = [1, 8, 128], strides = [1, 1, 1]} : vector<4x8x128xf32> to vector<1x8x128xf32>
    %434 = vector.shape_cast %433 : vector<1x8x128xf32> to vector<8x128xf32>
    %435 = arith.select %432, %434, %430 : vector<8x128xi1>, vector<8x128xf32>
    %c2_i32_113 = arith.constant 2 : i32
    %436 = vector.broadcast %c2_i32_113 : i32 to vector<8x128xi32>
    %437 = arith.cmpi eq, %424, %436 : vector<8x128xi32>
    %438 = vector.extract_strided_slice %220 {offsets = [2, 0, 0], sizes = [1, 8, 128], strides = [1, 1, 1]} : vector<4x8x128xf32> to vector<1x8x128xf32>
    %439 = vector.shape_cast %438 : vector<1x8x128xf32> to vector<8x128xf32>
    %440 = arith.select %437, %439, %435 : vector<8x128xi1>, vector<8x128xf32>
    %c3_i32_114 = arith.constant 3 : i32
    %441 = vector.broadcast %c3_i32_114 : i32 to vector<8x128xi32>
    %442 = arith.cmpi eq, %424, %441 : vector<8x128xi32>
    %443 = vector.extract_strided_slice %220 {offsets = [3, 0, 0], sizes = [1, 8, 128], strides = [1, 1, 1]} : vector<4x8x128xf32> to vector<1x8x128xf32>
    %444 = vector.shape_cast %443 : vector<1x8x128xf32> to vector<8x128xf32>
    %445 = arith.select %442, %444, %440 : vector<8x128xi1>, vector<8x128xf32>
    %446 = arith.subf %256, %445 : vector<8x128xf32>
    %cst_115 = arith.constant 0.000000e+00 : f32
    %447 = vector.broadcast %cst_115 : f32 to vector<8x128xf32>
    %448 = arith.select %346, %446, %447 : vector<8x128xi1>, vector<8x128xf32>
    %c0_116 = arith.constant 0 : index
    %c5 = arith.constant 5 : index
    %c0_117 = arith.constant 0 : index
    %c0_118 = arith.constant 0 : index
    %449 = vector.load %arg5[%c0_116, %c5, %c0_117, %c0_118] : memref<1x11x8x128xf32, #tpu.memory_space<vmem>>, vector<1x1x8x128xf32>
    %450 = vector.shape_cast %449 : vector<1x1x8x128xf32> to vector<8x128xf32>
    %451 = vector.shape_cast %448 : vector<8x128xf32> to vector<1x8x128xf32>
    %cst_119 = arith.constant dense<0.000000e+00> : vector<8x128xf32>
    %452 = vector.multi_reduction <add>, %451, %cst_119 [0] : vector<1x8x128xf32> to vector<8x128xf32>
    %453 = arith.addf %450, %452 : vector<8x128xf32>
    %c0_120 = arith.constant 0 : index
    %c5_121 = arith.constant 5 : index
    %c0_122 = arith.constant 0 : index
    %c0_123 = arith.constant 0 : index
    %454 = vector.load %arg5[%c0_120, %c5_121, %c0_122, %c0_123] : memref<1x11x8x128xf32, #tpu.memory_space<vmem>>, vector<1x1x8x128xf32>
    %455 = vector.shape_cast %454 : vector<1x1x8x128xf32> to vector<8x128xf32>
    %456 = vector.shape_cast %453 : vector<8x128xf32> to vector<1x1x8x128xf32>
    tpu.vector_store %arg5[%c0_120, %c5_121, %c0_122, %c0_123], %456 {strides = array<i32>} : memref<1x11x8x128xf32, #tpu.memory_space<vmem>>, vector<1x1x8x128xf32>,
    %c0_i32_124 = arith.constant 0 : i32
    %457 = vector.broadcast %c0_i32_124 : i32 to vector<8x128xi32>
    %458 = arith.select %280, %277, %457 : vector<8x128xi1>, vector<8x128xi32>
    %cst_125 = arith.constant 0.000000e+00 : f32
    %459 = vector.broadcast %cst_125 : f32 to vector<8x128xf32>
    %c0_i32_126 = arith.constant 0 : i32
    %460 = vector.broadcast %c0_i32_126 : i32 to vector<8x128xi32>
    %461 = arith.cmpi eq, %458, %460 : vector<8x128xi32>
    %462 = vector.extract_strided_slice %222 {offsets = [0, 0, 0], sizes = [1, 8, 128], strides = [1, 1, 1]} : vector<4x8x128xf32> to vector<1x8x128xf32>
    %463 = vector.shape_cast %462 : vector<1x8x128xf32> to vector<8x128xf32>
    %464 = arith.select %461, %463, %459 : vector<8x128xi1>, vector<8x128xf32>
    %c1_i32_127 = arith.constant 1 : i32
    %465 = vector.broadcast %c1_i32_127 : i32 to vector<8x128xi32>
    %466 = arith.cmpi eq, %458, %465 : vector<8x128xi32>
    %467 = vector.extract_strided_slice %222 {offsets = [1, 0, 0], sizes = [1, 8, 128], strides = [1, 1, 1]} : vector<4x8x128xf32> to vector<1x8x128xf32>
    %468 = vector.shape_cast %467 : vector<1x8x128xf32> to vector<8x128xf32>
    %469 = arith.select %466, %468, %464 : vector<8x128xi1>, vector<8x128xf32>
    %c2_i32_128 = arith.constant 2 : i32
    %470 = vector.broadcast %c2_i32_128 : i32 to vector<8x128xi32>
    %471 = arith.cmpi eq, %458, %470 : vector<8x128xi32>
    %472 = vector.extract_strided_slice %222 {offsets = [2, 0, 0], sizes = [1, 8, 128], strides = [1, 1, 1]} : vector<4x8x128xf32> to vector<1x8x128xf32>
    %473 = vector.shape_cast %472 : vector<1x8x128xf32> to vector<8x128xf32>
    %474 = arith.select %471, %473, %469 : vector<8x128xi1>, vector<8x128xf32>
    %c3_i32_129 = arith.constant 3 : i32
    %475 = vector.broadcast %c3_i32_129 : i32 to vector<8x128xi32>
    %476 = arith.cmpi eq, %458, %475 : vector<8x128xi32>
    %477 = vector.extract_strided_slice %222 {offsets = [3, 0, 0], sizes = [1, 8, 128], strides = [1, 1, 1]} : vector<4x8x128xf32> to vector<1x8x128xf32>
    %478 = vector.shape_cast %477 : vector<1x8x128xf32> to vector<8x128xf32>
    %479 = arith.select %476, %478, %474 : vector<8x128xi1>, vector<8x128xf32>
    %480 = arith.subf %322, %479 : vector<8x128xf32>
    %cst_130 = arith.constant 0.000000e+00 : f32
    %481 = vector.broadcast %cst_130 : f32 to vector<8x128xf32>
    %482 = arith.select %280, %480, %481 : vector<8x128xi1>, vector<8x128xf32>
    %c0_131 = arith.constant 0 : index
    %c6 = arith.constant 6 : index
    %c0_132 = arith.constant 0 : index
    %c0_133 = arith.constant 0 : index
    %483 = vector.load %arg5[%c0_131, %c6, %c0_132, %c0_133] : memref<1x11x8x128xf32, #tpu.memory_space<vmem>>, vector<1x1x8x128xf32>
    %484 = vector.shape_cast %483 : vector<1x1x8x128xf32> to vector<8x128xf32>
    %485 = vector.shape_cast %482 : vector<8x128xf32> to vector<1x8x128xf32>
    %cst_134 = arith.constant dense<0.000000e+00> : vector<8x128xf32>
    %486 = vector.multi_reduction <add>, %485, %cst_134 [0] : vector<1x8x128xf32> to vector<8x128xf32>
    %487 = arith.addf %484, %486 : vector<8x128xf32>
    %c0_135 = arith.constant 0 : index
    %c6_136 = arith.constant 6 : index
    %c0_137 = arith.constant 0 : index
    %c0_138 = arith.constant 0 : index
    %488 = vector.load %arg5[%c0_135, %c6_136, %c0_137, %c0_138] : memref<1x11x8x128xf32, #tpu.memory_space<vmem>>, vector<1x1x8x128xf32>
    %489 = vector.shape_cast %488 : vector<1x1x8x128xf32> to vector<8x128xf32>
    %490 = vector.shape_cast %487 : vector<8x128xf32> to vector<1x1x8x128xf32>
    tpu.vector_store %arg5[%c0_135, %c6_136, %c0_137, %c0_138], %490 {strides = array<i32>} : memref<1x11x8x128xf32, #tpu.memory_space<vmem>>, vector<1x1x8x128xf32>,
    %c0_i32_139 = arith.constant 0 : i32
    %491 = vector.broadcast %c0_i32_139 : i32 to vector<8x128xi32>
    %492 = arith.select %412, %409, %491 : vector<8x128xi1>, vector<8x128xi32>
    %cst_140 = arith.constant 0.000000e+00 : f32
    %493 = vector.broadcast %cst_140 : f32 to vector<8x128xf32>
    %c0_i32_141 = arith.constant 0 : i32
    %494 = vector.broadcast %c0_i32_141 : i32 to vector<8x128xi32>
    %495 = arith.cmpi eq, %492, %494 : vector<8x128xi32>
    %496 = vector.extract_strided_slice %220 {offsets = [0, 0, 0], sizes = [1, 8, 128], strides = [1, 1, 1]} : vector<4x8x128xf32> to vector<1x8x128xf32>
    %497 = vector.shape_cast %496 : vector<1x8x128xf32> to vector<8x128xf32>
    %498 = arith.select %495, %497, %493 : vector<8x128xi1>, vector<8x128xf32>
    %c1_i32_142 = arith.constant 1 : i32
    %499 = vector.broadcast %c1_i32_142 : i32 to vector<8x128xi32>
    %500 = arith.cmpi eq, %492, %499 : vector<8x128xi32>
    %501 = vector.extract_strided_slice %220 {offsets = [1, 0, 0], sizes = [1, 8, 128], strides = [1, 1, 1]} : vector<4x8x128xf32> to vector<1x8x128xf32>
    %502 = vector.shape_cast %501 : vector<1x8x128xf32> to vector<8x128xf32>
    %503 = arith.select %500, %502, %498 : vector<8x128xi1>, vector<8x128xf32>
    %c2_i32_143 = arith.constant 2 : i32
    %504 = vector.broadcast %c2_i32_143 : i32 to vector<8x128xi32>
    %505 = arith.cmpi eq, %492, %504 : vector<8x128xi32>
    %506 = vector.extract_strided_slice %220 {offsets = [2, 0, 0], sizes = [1, 8, 128], strides = [1, 1, 1]} : vector<4x8x128xf32> to vector<1x8x128xf32>
    %507 = vector.shape_cast %506 : vector<1x8x128xf32> to vector<8x128xf32>
    %508 = arith.select %505, %507, %503 : vector<8x128xi1>, vector<8x128xf32>
    %c3_i32_144 = arith.constant 3 : i32
    %509 = vector.broadcast %c3_i32_144 : i32 to vector<8x128xi32>
    %510 = arith.cmpi eq, %492, %509 : vector<8x128xi32>
    %511 = vector.extract_strided_slice %220 {offsets = [3, 0, 0], sizes = [1, 8, 128], strides = [1, 1, 1]} : vector<4x8x128xf32> to vector<1x8x128xf32>
    %512 = vector.shape_cast %511 : vector<1x8x128xf32> to vector<8x128xf32>
    %513 = arith.select %510, %512, %508 : vector<8x128xi1>, vector<8x128xf32>
    %514 = arith.subf %256, %513 : vector<8x128xf32>
    %cst_145 = arith.constant 0.000000e+00 : f32
    %515 = vector.broadcast %cst_145 : f32 to vector<8x128xf32>
    %516 = arith.select %412, %514, %515 : vector<8x128xi1>, vector<8x128xf32>
    %c0_146 = arith.constant 0 : index
    %c7 = arith.constant 7 : index
    %c0_147 = arith.constant 0 : index
    %c0_148 = arith.constant 0 : index
    %517 = vector.load %arg5[%c0_146, %c7, %c0_147, %c0_148] : memref<1x11x8x128xf32, #tpu.memory_space<vmem>>, vector<1x1x8x128xf32>
    %518 = vector.shape_cast %517 : vector<1x1x8x128xf32> to vector<8x128xf32>
    %519 = vector.shape_cast %516 : vector<8x128xf32> to vector<1x8x128xf32>
    %cst_149 = arith.constant dense<0.000000e+00> : vector<8x128xf32>
    %520 = vector.multi_reduction <add>, %519, %cst_149 [0] : vector<1x8x128xf32> to vector<8x128xf32>
    %521 = arith.addf %518, %520 : vector<8x128xf32>
    %c0_150 = arith.constant 0 : index
    %c7_151 = arith.constant 7 : index
    %c0_152 = arith.constant 0 : index
    %c0_153 = arith.constant 0 : index
    %522 = vector.load %arg5[%c0_150, %c7_151, %c0_152, %c0_153] : memref<1x11x8x128xf32, #tpu.memory_space<vmem>>, vector<1x1x8x128xf32>
    %523 = vector.shape_cast %522 : vector<1x1x8x128xf32> to vector<8x128xf32>
    %524 = vector.shape_cast %521 : vector<8x128xf32> to vector<1x1x8x128xf32>
    tpu.vector_store %arg5[%c0_150, %c7_151, %c0_152, %c0_153], %524 {strides = array<i32>} : memref<1x11x8x128xf32, #tpu.memory_space<vmem>>, vector<1x1x8x128xf32>,
    %c0_i32_154 = arith.constant 0 : i32
    %525 = vector.broadcast %c0_i32_154 : i32 to vector<8x128xi32>
    %526 = arith.select %280, %277, %525 : vector<8x128xi1>, vector<8x128xi32>
    %cst_155 = arith.constant 0.000000e+00 : f32
    %527 = vector.broadcast %cst_155 : f32 to vector<8x128xf32>
    %c0_i32_156 = arith.constant 0 : i32
    %528 = vector.broadcast %c0_i32_156 : i32 to vector<8x128xi32>
    %529 = arith.cmpi eq, %526, %528 : vector<8x128xi32>
    %530 = vector.extract_strided_slice %224 {offsets = [0, 0, 0], sizes = [1, 8, 128], strides = [1, 1, 1]} : vector<4x8x128xf32> to vector<1x8x128xf32>
    %531 = vector.shape_cast %530 : vector<1x8x128xf32> to vector<8x128xf32>
    %532 = arith.select %529, %531, %527 : vector<8x128xi1>, vector<8x128xf32>
    %c1_i32_157 = arith.constant 1 : i32
    %533 = vector.broadcast %c1_i32_157 : i32 to vector<8x128xi32>
    %534 = arith.cmpi eq, %526, %533 : vector<8x128xi32>
    %535 = vector.extract_strided_slice %224 {offsets = [1, 0, 0], sizes = [1, 8, 128], strides = [1, 1, 1]} : vector<4x8x128xf32> to vector<1x8x128xf32>
    %536 = vector.shape_cast %535 : vector<1x8x128xf32> to vector<8x128xf32>
    %537 = arith.select %534, %536, %532 : vector<8x128xi1>, vector<8x128xf32>
    %c2_i32_158 = arith.constant 2 : i32
    %538 = vector.broadcast %c2_i32_158 : i32 to vector<8x128xi32>
    %539 = arith.cmpi eq, %526, %538 : vector<8x128xi32>
    %540 = vector.extract_strided_slice %224 {offsets = [2, 0, 0], sizes = [1, 8, 128], strides = [1, 1, 1]} : vector<4x8x128xf32> to vector<1x8x128xf32>
    %541 = vector.shape_cast %540 : vector<1x8x128xf32> to vector<8x128xf32>
    %542 = arith.select %539, %541, %537 : vector<8x128xi1>, vector<8x128xf32>
    %c3_i32_159 = arith.constant 3 : i32
    %543 = vector.broadcast %c3_i32_159 : i32 to vector<8x128xi32>
    %544 = arith.cmpi eq, %526, %543 : vector<8x128xi32>
    %545 = vector.extract_strided_slice %224 {offsets = [3, 0, 0], sizes = [1, 8, 128], strides = [1, 1, 1]} : vector<4x8x128xf32> to vector<1x8x128xf32>
    %546 = vector.shape_cast %545 : vector<1x8x128xf32> to vector<8x128xf32>
    %547 = arith.select %544, %546, %542 : vector<8x128xi1>, vector<8x128xf32>
    %548 = arith.subf %388, %547 : vector<8x128xf32>
    %cst_160 = arith.constant 0.000000e+00 : f32
    %549 = vector.broadcast %cst_160 : f32 to vector<8x128xf32>
    %550 = arith.select %280, %548, %549 : vector<8x128xi1>, vector<8x128xf32>
    %c0_161 = arith.constant 0 : index
    %c8 = arith.constant 8 : index
    %c0_162 = arith.constant 0 : index
    %c0_163 = arith.constant 0 : index
    %551 = vector.load %arg5[%c0_161, %c8, %c0_162, %c0_163] : memref<1x11x8x128xf32, #tpu.memory_space<vmem>>, vector<1x1x8x128xf32>
    %552 = vector.shape_cast %551 : vector<1x1x8x128xf32> to vector<8x128xf32>
    %553 = vector.shape_cast %550 : vector<8x128xf32> to vector<1x8x128xf32>
    %cst_164 = arith.constant dense<0.000000e+00> : vector<8x128xf32>
    %554 = vector.multi_reduction <add>, %553, %cst_164 [0] : vector<1x8x128xf32> to vector<8x128xf32>
    %555 = arith.addf %552, %554 : vector<8x128xf32>
    %c0_165 = arith.constant 0 : index
    %c8_166 = arith.constant 8 : index
    %c0_167 = arith.constant 0 : index
    %c0_168 = arith.constant 0 : index
    %556 = vector.load %arg5[%c0_165, %c8_166, %c0_167, %c0_168] : memref<1x11x8x128xf32, #tpu.memory_space<vmem>>, vector<1x1x8x128xf32>
    %557 = vector.shape_cast %556 : vector<1x1x8x128xf32> to vector<8x128xf32>
    %558 = vector.shape_cast %555 : vector<8x128xf32> to vector<1x1x8x128xf32>
    tpu.vector_store %arg5[%c0_165, %c8_166, %c0_167, %c0_168], %558 {strides = array<i32>} : memref<1x11x8x128xf32, #tpu.memory_space<vmem>>, vector<1x1x8x128xf32>,
    %c0_i32_169 = arith.constant 0 : i32
    %559 = vector.broadcast %c0_i32_169 : i32 to vector<8x128xi32>
    %560 = arith.select %412, %409, %559 : vector<8x128xi1>, vector<8x128xi32>
    %cst_170 = arith.constant 0.000000e+00 : f32
    %561 = vector.broadcast %cst_170 : f32 to vector<8x128xf32>
    %c0_i32_171 = arith.constant 0 : i32
    %562 = vector.broadcast %c0_i32_171 : i32 to vector<8x128xi32>
    %563 = arith.cmpi eq, %560, %562 : vector<8x128xi32>
    %564 = vector.extract_strided_slice %222 {offsets = [0, 0, 0], sizes = [1, 8, 128], strides = [1, 1, 1]} : vector<4x8x128xf32> to vector<1x8x128xf32>
    %565 = vector.shape_cast %564 : vector<1x8x128xf32> to vector<8x128xf32>
    %566 = arith.select %563, %565, %561 : vector<8x128xi1>, vector<8x128xf32>
    %c1_i32_172 = arith.constant 1 : i32
    %567 = vector.broadcast %c1_i32_172 : i32 to vector<8x128xi32>
    %568 = arith.cmpi eq, %560, %567 : vector<8x128xi32>
    %569 = vector.extract_strided_slice %222 {offsets = [1, 0, 0], sizes = [1, 8, 128], strides = [1, 1, 1]} : vector<4x8x128xf32> to vector<1x8x128xf32>
    %570 = vector.shape_cast %569 : vector<1x8x128xf32> to vector<8x128xf32>
    %571 = arith.select %568, %570, %566 : vector<8x128xi1>, vector<8x128xf32>
    %c2_i32_173 = arith.constant 2 : i32
    %572 = vector.broadcast %c2_i32_173 : i32 to vector<8x128xi32>
    %573 = arith.cmpi eq, %560, %572 : vector<8x128xi32>
    %574 = vector.extract_strided_slice %222 {offsets = [2, 0, 0], sizes = [1, 8, 128], strides = [1, 1, 1]} : vector<4x8x128xf32> to vector<1x8x128xf32>
    %575 = vector.shape_cast %574 : vector<1x8x128xf32> to vector<8x128xf32>
    %576 = arith.select %573, %575, %571 : vector<8x128xi1>, vector<8x128xf32>
    %c3_i32_174 = arith.constant 3 : i32
    %577 = vector.broadcast %c3_i32_174 : i32 to vector<8x128xi32>
    %578 = arith.cmpi eq, %560, %577 : vector<8x128xi32>
    %579 = vector.extract_strided_slice %222 {offsets = [3, 0, 0], sizes = [1, 8, 128], strides = [1, 1, 1]} : vector<4x8x128xf32> to vector<1x8x128xf32>
    %580 = vector.shape_cast %579 : vector<1x8x128xf32> to vector<8x128xf32>
    %581 = arith.select %578, %580, %576 : vector<8x128xi1>, vector<8x128xf32>
    %582 = arith.subf %322, %581 : vector<8x128xf32>
    %cst_175 = arith.constant 0.000000e+00 : f32
    %583 = vector.broadcast %cst_175 : f32 to vector<8x128xf32>
    %584 = arith.select %412, %582, %583 : vector<8x128xi1>, vector<8x128xf32>
    %c0_176 = arith.constant 0 : index
    %c9 = arith.constant 9 : index
    %c0_177 = arith.constant 0 : index
    %c0_178 = arith.constant 0 : index
    %585 = vector.load %arg5[%c0_176, %c9, %c0_177, %c0_178] : memref<1x11x8x128xf32, #tpu.memory_space<vmem>>, vector<1x1x8x128xf32>
    %586 = vector.shape_cast %585 : vector<1x1x8x128xf32> to vector<8x128xf32>
    %587 = vector.shape_cast %584 : vector<8x128xf32> to vector<1x8x128xf32>
    %cst_179 = arith.constant dense<0.000000e+00> : vector<8x128xf32>
    %588 = vector.multi_reduction <add>, %587, %cst_179 [0] : vector<1x8x128xf32> to vector<8x128xf32>
    %589 = arith.addf %586, %588 : vector<8x128xf32>
    %c0_180 = arith.constant 0 : index
    %c9_181 = arith.constant 9 : index
    %c0_182 = arith.constant 0 : index
    %c0_183 = arith.constant 0 : index
    %590 = vector.load %arg5[%c0_180, %c9_181, %c0_182, %c0_183] : memref<1x11x8x128xf32, #tpu.memory_space<vmem>>, vector<1x1x8x128xf32>
    %591 = vector.shape_cast %590 : vector<1x1x8x128xf32> to vector<8x128xf32>
    %592 = vector.shape_cast %589 : vector<8x128xf32> to vector<1x1x8x128xf32>
    tpu.vector_store %arg5[%c0_180, %c9_181, %c0_182, %c0_183], %592 {strides = array<i32>} : memref<1x11x8x128xf32, #tpu.memory_space<vmem>>, vector<1x1x8x128xf32>,
    %c0_i32_184 = arith.constant 0 : i32
    %593 = vector.broadcast %c0_i32_184 : i32 to vector<8x128xi32>
    %594 = arith.select %346, %343, %593 : vector<8x128xi1>, vector<8x128xi32>
    %cst_185 = arith.constant 0.000000e+00 : f32
    %595 = vector.broadcast %cst_185 : f32 to vector<8x128xf32>
    %c0_i32_186 = arith.constant 0 : i32
    %596 = vector.broadcast %c0_i32_186 : i32 to vector<8x128xi32>
    %597 = arith.cmpi eq, %594, %596 : vector<8x128xi32>
    %598 = vector.extract_strided_slice %224 {offsets = [0, 0, 0], sizes = [1, 8, 128], strides = [1, 1, 1]} : vector<4x8x128xf32> to vector<1x8x128xf32>
    %599 = vector.shape_cast %598 : vector<1x8x128xf32> to vector<8x128xf32>
    %600 = arith.select %597, %599, %595 : vector<8x128xi1>, vector<8x128xf32>
    %c1_i32_187 = arith.constant 1 : i32
    %601 = vector.broadcast %c1_i32_187 : i32 to vector<8x128xi32>
    %602 = arith.cmpi eq, %594, %601 : vector<8x128xi32>
    %603 = vector.extract_strided_slice %224 {offsets = [1, 0, 0], sizes = [1, 8, 128], strides = [1, 1, 1]} : vector<4x8x128xf32> to vector<1x8x128xf32>
    %604 = vector.shape_cast %603 : vector<1x8x128xf32> to vector<8x128xf32>
    %605 = arith.select %602, %604, %600 : vector<8x128xi1>, vector<8x128xf32>
    %c2_i32_188 = arith.constant 2 : i32
    %606 = vector.broadcast %c2_i32_188 : i32 to vector<8x128xi32>
    %607 = arith.cmpi eq, %594, %606 : vector<8x128xi32>
    %608 = vector.extract_strided_slice %224 {offsets = [2, 0, 0], sizes = [1, 8, 128], strides = [1, 1, 1]} : vector<4x8x128xf32> to vector<1x8x128xf32>
    %609 = vector.shape_cast %608 : vector<1x8x128xf32> to vector<8x128xf32>
    %610 = arith.select %607, %609, %605 : vector<8x128xi1>, vector<8x128xf32>
    %c3_i32_189 = arith.constant 3 : i32
    %611 = vector.broadcast %c3_i32_189 : i32 to vector<8x128xi32>
    %612 = arith.cmpi eq, %594, %611 : vector<8x128xi32>
    %613 = vector.extract_strided_slice %224 {offsets = [3, 0, 0], sizes = [1, 8, 128], strides = [1, 1, 1]} : vector<4x8x128xf32> to vector<1x8x128xf32>
    %614 = vector.shape_cast %613 : vector<1x8x128xf32> to vector<8x128xf32>
    %615 = arith.select %612, %614, %610 : vector<8x128xi1>, vector<8x128xf32>
    %616 = arith.subf %388, %615 : vector<8x128xf32>
    %cst_190 = arith.constant 0.000000e+00 : f32
    %617 = vector.broadcast %cst_190 : f32 to vector<8x128xf32>
    %618 = arith.select %346, %616, %617 : vector<8x128xi1>, vector<8x128xf32>
    %c0_191 = arith.constant 0 : index
    %c10 = arith.constant 10 : index
    %c0_192 = arith.constant 0 : index
    %c0_193 = arith.constant 0 : index
    %619 = vector.load %arg5[%c0_191, %c10, %c0_192, %c0_193] : memref<1x11x8x128xf32, #tpu.memory_space<vmem>>, vector<1x1x8x128xf32>
    %620 = vector.shape_cast %619 : vector<1x1x8x128xf32> to vector<8x128xf32>
    %621 = vector.shape_cast %618 : vector<8x128xf32> to vector<1x8x128xf32>
    %cst_194 = arith.constant dense<0.000000e+00> : vector<8x128xf32>
    %622 = vector.multi_reduction <add>, %621, %cst_194 [0] : vector<1x8x128xf32> to vector<8x128xf32>
    %623 = arith.addf %620, %622 : vector<8x128xf32>
    %c0_195 = arith.constant 0 : index
    %c10_196 = arith.constant 10 : index
    %c0_197 = arith.constant 0 : index
    %c0_198 = arith.constant 0 : index
    %624 = vector.load %arg5[%c0_195, %c10_196, %c0_197, %c0_198] : memref<1x11x8x128xf32, #tpu.memory_space<vmem>>, vector<1x1x8x128xf32>
    %625 = vector.shape_cast %624 : vector<1x1x8x128xf32> to vector<8x128xf32>
    %626 = vector.shape_cast %623 : vector<8x128xf32> to vector<1x1x8x128xf32>
    tpu.vector_store %arg5[%c0_195, %c10_196, %c0_197, %c0_198], %626 {strides = array<i32>} : memref<1x11x8x128xf32, #tpu.memory_space<vmem>>, vector<1x1x8x128xf32>,
    return
  }
  func.func @transform_0(%arg0: i32, %arg1: i32) -> (i32, i32, i32) {
    %c0_i32 = arith.constant 0 : i32
    %c0_i32_0 = arith.constant 0 : i32
    return %arg0, %arg1, %c0_i32 : i32, i32, i32
  }
  func.func @transform_1(%arg0: i32, %arg1: i32) -> (i32, i32, i32, i32, i32) {
    %c0_i32 = arith.constant 0 : i32
    %c0_i32_0 = arith.constant 0 : i32
    %c0_i32_1 = arith.constant 0 : i32
    %c0_i32_2 = arith.constant 0 : i32
    return %c0_i32, %arg0, %c0_i32_0, %arg1, %c0_i32_1 : i32, i32, i32, i32, i32
  }
  func.func @transform_2(%arg0: i32, %arg1: i32) -> (i32, i32, i32, i32, i32) {
    %c0_i32 = arith.constant 0 : i32
    %c0_i32_0 = arith.constant 0 : i32
    %c0_i32_1 = arith.constant 0 : i32
    %c0_i32_2 = arith.constant 0 : i32
    return %c0_i32, %arg0, %c0_i32_0, %arg1, %c0_i32_1 : i32, i32, i32, i32, i32
  }
  func.func @transform_3(%arg0: i32, %arg1: i32) -> (i32, i32, i32, i32) {
    %c0_i32 = arith.constant 0 : i32
    %c0_i32_0 = arith.constant 0 : i32
    %c0_i32_1 = arith.constant 0 : i32
    %c0_i32_2 = arith.constant 0 : i32
    return %arg0, %c0_i32, %c0_i32_0, %c0_i32_1 : i32, i32, i32, i32
  }
}

</mosaic_0001>

<bundles_post_ra>
// kernel: combined_cps_loss.1
= control target key start
LH: loop header
LB: loop body
LE: loop exit
PB: predicated region body
PF: predicated region fallthrough
CT: control target
= control target key end

     0   :  { %s1074_s12 = smov 0   ;;  %s1076_s13 = smov 0   ;;  %s1547_s0 = inlined_call_operand.vmem [shape: s32[2,8,128], index: 0, kind: input, shape index: {}]   ;;  %s1548_s1 = inlined_call_operand.vmem [shape: f32[3,2,4,8,128], index: 1, kind: input, shape index: {}]   ;;  %s1549_s2 = inlined_call_operand.vmem [shape: f32[3,2,4,8,128], index: 2, kind: input, shape index: {}]   ;;  %s1550_s3 = inlined_call_operand.vmem [shape: f32[2,11,8,128], index: 3, kind: output, shape index: {}]  }
   0x1   :  { %s1078_s14 = smov 0   ;;  %s1080_s15 = smov 0  }
   0x2   :  { %s1082_s16 = smov 0  }
   0x3 LB: > { %s25_s17 = sadd.s32 1, %s1046_s15  ;;  %p69_p1 = scmp.ne.s32.totalorder %s1038_s13, %s1034_s12  ;;  %s1050_s16 = sphi %s1082_s16, %s13_s16   ;;  %s1046_s15 = sphi %s1080_s15, %s1561_s15   ;;  %s1042_s14 = sphi %s1078_s14, %s1560_s14   ;;  %s1038_s13 = sphi %s1076_s13, %s1559_s13   ;;  %s1034_s12 = sphi %s1074_s12, %s1558_s12  }
   0x4   : > { %p27_p0 = scmp.ge.s32.totalorder %s25_s17, 2  ;;  %p70_p2 = scmp.eq.s32.totalorder %s1050_s16, 0 }
   0x5   : > { %s62_s20 = sadd.s32 1, %s1038_s13  ;;  %p854_p5 = scmp.ge.s32.totalorder %s1050_s16, 2 }
   0x6   : > { %s1563_s17 = smov (%p27_p0, %s25_s17), 0  ;;  %p1105_p3 = por %p70_p2, %p69_p1 }
   0x7   : > { %s57_s19 = ssub.s32 %s1046_s15, %s1563_s17  ;;  %149 = sbr.rel (%p854_p5) target bundleno = 36 (0x24), region = 16 }
   0x8   : > { %p60_p4 = scmp.eq.s32.totalorder %s57_s19, 0 }
   0xa   : > { %s1113_s21 = scalar_select %p60_p4, %s1038_s13, %s62_s20  }
   0xe   : > { %162 = sbr.rel (!%p1105_p3) target bundleno = 25 (0x19), region = 24  ;;  %s164_s22 = sand.u32 (%p1105_p3), 1, %s1038_s13  }
   0xf   : > { %s904_s23 = sshll.u32 (%p1105_p3), %s1046_s15, 5  ;;  %s906_s24 = smul.u32 (%p1105_p3), 96, %s164_s22 }
  0x10   : > { %s170_s27 = scalar_lea.vmem (%p1105_p3), %s1548_s1, %s904_s23 }
  0x11   : > { %v220_v0 = vld [vmem:[%s170_s27] sm:$0xff] (%p1105_p3)  ;;  %v222_v1 = vld [vmem:[%s170_s27 + $0x8] sm:$0xff] (%p1105_p3)  ;;  %v224_v2 = vld [vmem:[%s170_s27 + $0x10] sm:$0xff] (%p1105_p3)  ;;  %s166_s28 = scalar_lea.vmem (%p1105_p3), [#allocation2], %s906_s24 }
  0x12   : > { %v226_v3 = vld [vmem:[%s170_s27 + $0x18] sm:$0xff] (%p1105_p3)  ;;  %v228_v4 = vld [vmem:[%s170_s27 + $0x40] sm:$0xff] (%p1105_p3)  ;;  %v230_v5 = vld [vmem:[%s170_s27 + $0x48] sm:$0xff] (%p1105_p3)  ;;  %221 = vst [vmem:[%s166_s28] sm:$0xff] (%p1105_p3), %v220_v0 }
  0x13   : > { %223 = vst [vmem:[%s166_s28 + $0x8] sm:$0xff] (%p1105_p3), %v222_v1  ;;  %225 = vst [vmem:[%s166_s28 + $0x10] sm:$0xff] (%p1105_p3), %v224_v2  ;;  %v232_v6 = vld [vmem:[%s170_s27 + $0x50] sm:$0xff] (%p1105_p3)  ;;  %v234_v7 = vld [vmem:[%s170_s27 + $0x58] sm:$0xff] (%p1105_p3) }
  0x14   : > { %227 = vst [vmem:[%s166_s28 + $0x18] sm:$0xff] (%p1105_p3), %v226_v3  ;;  %229 = vst [vmem:[%s166_s28 + $0x20] sm:$0xff] (%p1105_p3), %v228_v4  ;;  %v236_v8 = vld [vmem:[%s170_s27 + $0x80] sm:$0xff] (%p1105_p3)  ;;  %v238_v9 = vld [vmem:[%s170_s27 + $0x88] sm:$0xff] (%p1105_p3) }
  0x15   : > { %231 = vst [vmem:[%s166_s28 + $0x28] sm:$0xff] %v230_v5  ;;  %233 = vst [vmem:[%s166_s28 + $0x30] sm:$0xff] %v232_v6  ;;  %v240_v10 = vld [vmem:[%s170_s27 + $0x90] sm:$0xff]  ;;  %v242_v11 = vld [vmem:[%s170_s27 + $0x98] sm:$0xff] }
  0x16   : > { %235 = vst [vmem:[%s166_s28 + $0x38] sm:$0xff] %v234_v7  ;;  %237 = vst [vmem:[%s166_s28 + $0x40] sm:$0xff] %v236_v8 }
  0x17   : > { %239 = vst [vmem:[%s166_s28 + $0x48] sm:$0xff] %v238_v9  ;;  %241 = vst [vmem:[%s166_s28 + $0x50] sm:$0xff] %v240_v10 }
  0x18   : > { %243 = vst [vmem:[%s166_s28 + $0x58] sm:$0xff] %v242_v11 }
  0x19 PF: > { %249 = sbr.rel (!%p1105_p3) target bundleno = 36 (0x24), region = 62  ;;  %s251_s29 = sand.u32 (%p1105_p3), 1, %s1038_s13  }
  0x1a   : > { %s905_s30 = sshll.u32 (%p1105_p3), %s1046_s15, 5  ;;  %s907_s4 = smul.u32 (%p1105_p3), 96, %s251_s29 }
  0x1b   : > { %s257_s7 = scalar_lea.vmem (%p1105_p3), %s1549_s2, %s905_s30 }
  0x1c   : > { %v307_v12 = vld [vmem:[%s257_s7] sm:$0xff] (%p1105_p3)  ;;  %v309_v13 = vld [vmem:[%s257_s7 + $0x8] sm:$0xff] (%p1105_p3)  ;;  %v311_v14 = vld [vmem:[%s257_s7 + $0x10] sm:$0xff] (%p1105_p3)  ;;  %s253_s8 = scalar_lea.vmem (%p1105_p3), [#allocation3], %s907_s4 }
  0x1d   : > { %v313_v15 = vld [vmem:[%s257_s7 + $0x18] sm:$0xff] (%p1105_p3)  ;;  %v315_v16 = vld [vmem:[%s257_s7 + $0x40] sm:$0xff] (%p1105_p3)  ;;  %v317_v17 = vld [vmem:[%s257_s7 + $0x48] sm:$0xff] (%p1105_p3)  ;;  %308 = vst [vmem:[%s253_s8] sm:$0xff] (%p1105_p3), %v307_v12 }
  0x1e   : > { %310 = vst [vmem:[%s253_s8 + $0x8] sm:$0xff] (%p1105_p3), %v309_v13  ;;  %312 = vst [vmem:[%s253_s8 + $0x10] sm:$0xff] (%p1105_p3), %v311_v14  ;;  %v319_v18 = vld [vmem:[%s257_s7 + $0x50] sm:$0xff] (%p1105_p3)  ;;  %v321_v19 = vld [vmem:[%s257_s7 + $0x58] sm:$0xff] (%p1105_p3) }
  0x1f   : > { %314 = vst [vmem:[%s253_s8 + $0x18] sm:$0xff] (%p1105_p3), %v313_v15  ;;  %316 = vst [vmem:[%s253_s8 + $0x20] sm:$0xff] (%p1105_p3), %v315_v16  ;;  %v323_v20 = vld [vmem:[%s257_s7 + $0x80] sm:$0xff] (%p1105_p3)  ;;  %v325_v21 = vld [vmem:[%s257_s7 + $0x88] sm:$0xff] (%p1105_p3) }
  0x20   : > { %318 = vst [vmem:[%s253_s8 + $0x28] sm:$0xff] %v317_v17  ;;  %320 = vst [vmem:[%s253_s8 + $0x30] sm:$0xff] %v319_v18  ;;  %v327_v22 = vld [vmem:[%s257_s7 + $0x90] sm:$0xff]  ;;  %v329_v23 = vld [vmem:[%s257_s7 + $0x98] sm:$0xff] }
  0x21   : > { %322 = vst [vmem:[%s253_s8 + $0x38] sm:$0xff] %v321_v19  ;;  %324 = vst [vmem:[%s253_s8 + $0x40] sm:$0xff] %v323_v20 }
  0x22   : > { %326 = vst [vmem:[%s253_s8 + $0x48] sm:$0xff] %v325_v21  ;;  %328 = vst [vmem:[%s253_s8 + $0x50] sm:$0xff] %v327_v22 }
  0x23   : > { %330 = vst [vmem:[%s253_s8 + $0x58] sm:$0xff] %v329_v23 }
  0x24 PF: > { %p859_p6 = scmp.ge.s32.totalorder %s1050_s16, 1  ;;  %p335_p7 = scmp.lt.s32.totalorder %s1050_s16, 3 }
  0x26   : > { %p336_p8 = pnand %p859_p6, %p335_p7 }
  0x27   : > { %p383_p9 = scmp.lt.s32.totalorder (!%p336_p8), %s1042_s14, 1  ;;  %s342_s9 = sand.u32 (!%p336_p8), 1, %s1034_s12   ;;  %v1052_v57 = vmov (!%p336_p8), 0.0   ;;  %v410_v6 = vlaneseq (!%p336_p8) }
  0x28   : > { %339 = sbr.rel (%p336_p8) target bundleno = 120 (0x78), region = 100 }
  0x29   : > { %s1134_s10 = smul.u32 (!%p336_p8), 96, %s342_s9  ;;  %v411_v22 = vshrl.u32 (!%p336_p8), %v410_v6, 7 }
  0x2b   : > { %s1141_s18 = scalar_lea.vmem (!%p336_p8), [#allocation2], %s1134_s10 }
  0x2c   : > { %v1144_v24 = vld [vmem:[%s1141_s18] sm:$0xff] (!%p336_p8)  ;;  %v1147_v25 = vld [vmem:[%s1141_s18 + $0x8] sm:$0xff] (!%p336_p8)  ;;  %v1150_v26 = vld [vmem:[%s1141_s18 + $0x10] sm:$0xff] (!%p336_p8) }
  0x2d   : > { %v426_v27 = vmax.f32 (!%p336_p8), %v1144_v24, %v1147_v25  ;;  %v1155_v28 = vld [vmem:[%s1141_s18 + $0x20] sm:$0xff] (!%p336_p8)  ;;  %v1158_v29 = vld [vmem:[%s1141_s18 + $0x28] sm:$0xff] (!%p336_p8)  ;;  %v1164_v30 = vld [vmem:[%s1141_s18 + $0x18] sm:$0xff] (!%p336_p8) }
  0x2e   : > { %v1167_v31 = vld [vmem:[%s1141_s18 + $0x30] sm:$0xff] (!%p336_p8)  ;;  %v464_v32 = vmax.f32 (!%p336_p8), %v1155_v28, %v1158_v29  ;;  %v1173_v34 = vld [vmem:[%s1141_s18 + $0x38] sm:$0xff] (!%p336_p8)  ;;  %v1182_v38 = vld [vmem:[%s1141_s18 + $0x40] sm:$0xff] (!%p336_p8) }
  0x2f   : > { %s1565_s14 = smov (!%p383_p9, %s1042_s14), 1  ;;  %v427_v33 = vmax.f32 %v426_v27, %v1150_v26  ;;  %v1185_v39 = vld [vmem:[%s1141_s18 + $0x48] sm:$0xff]  ;;  %v1205_v47 = vld [vmem:[%s1141_s18 + $0x50] sm:$0xff]  ;;  %v1214_v56 = vld [vmem:[%s1141_s18 + $0x58] sm:$0xff] }
  0x30   : > { %s860_s11 = sshll.u32 %s1565_s14, 3  ;;  %v465_v35 = vmax.f32 %v464_v32, %v1167_v31  ;;  %s909_s22 = smul.u32 88, %s1565_s14  ;;  %v497_v48 = vmax.f32 %v1182_v38, %v1185_v39 }
  0x31   : > { %s389_s20 = scalar_lea.vmem %s1547_s0, %s860_s11  ;;  %v1179_v37 = vmax.f32 %v427_v33, %v1164_v30  ;;  %s1226_s14 = scalar_lea.vmem [#allocation3], %s1134_s10 }
  0x32   : > { %v1176_v36 = vld [vmem:[%s389_s20] sm:$0xff]  ;;  %v1188_v40 = vmax.f32 %v465_v35, %v1173_v34  ;;  %v498_v61 = vmax.f32 %v497_v48, %v1205_v47  ;;  %v1232_v63 = vld [vmem:[%s1226_s14 + $0x8] sm:$0xff]  ;;  %s1237_s25 = scalar_lea.vmem %s1550_s3, %s909_s22  ;;  %v1243_v3 = vld [vmem:[%s1226_s14 + $0x10] sm:$0xff] }
  0x33   : > { %v429_v41 = vsub.f32 %v1144_v24, %v1179_v37  ;;  %v432_v42 = vsub.f32 %v1147_v25, %v1179_v37  ;;  %v436_v43 = vsub.f32 %v1150_v26, %v1179_v37  ;;  %v440_v44 = vsub.f32 %v1164_v30, %v1179_v37  ;;  %v1229_v62 = vld [vmem:[%s1226_s14] sm:$0xff]  ;;  %v1249_v5 = vld [vmem:[%s1226_s14 + $0x28] sm:$0xff]  ;;  %v1262_v11 = vld [vmem:[%s1226_s14 + $0x18] sm:$0xff] }
  0x34   : > { %vm421_vm0 = vcmp.ne.s32.totalorder %v1176_v36, 4294967295  ;;  %v467_v45 = vsub.f32 %v1155_v28, %v1188_v40  ;;  %v470_v46 = vsub.f32 %v1158_v29, %v1188_v40  ;;  %v474_v52 = vsub.f32 %v1167_v31, %v1188_v40  ;;  %v1246_v4 = vld [vmem:[%s1226_s14 + $0x20] sm:$0xff]  ;;  %v1277_v21 = vld [vmem:[%s1226_s14 + $0x30] sm:$0xff] }
  0x35   : > { %v430_v49 = vmul.f32 1.442695, %v429_v41  ;;  %v433_v50 = vmul.f32 1.442695, %v432_v42  ;;  %v437_v51 = vmul.f32 1.442695, %v436_v43  ;;  %v478_v55 = vsub.f32 %v1173_v34, %v1188_v40 }
  0x36   : > { %v441_v53 = vmul.f32 1.442695, %v440_v44  ;;  %v468_v54 = vmul.f32 1.442695, %v467_v45  ;;  %v870_v58 = vsel %vm421_vm0, 1.0, %v1052_v57  ;;  %v1222_v59 = vsel %vm421_vm0, %v1176_v36, 0 }
  0x37   : > { %952 = vpow2.f32 %v430_v49  ;;  %v471_v60 = vmul.f32 1.442695, %v470_v46  ;;  %v475_v0 = vmul.f32 1.442695, %v474_v52  ;;  %v479_v1 = vmul.f32 1.442695, %v478_v55 }
  0x38   : > { %954 = vpow2.f32 %v433_v50  ;;  %v1240_v2 = vmax.f32 %v498_v61, %v1214_v56  ;;  %vm448_vm1 = vcmp.eq.s32.totalorder %v1222_v59, 0  ;;  %v550_v7 = vmax.f32 %v1229_v62, %v1232_v63  ;;  %872 = vst [vmem:[%s1237_s25 + $0x8] sm:$0xff] %v870_v58  ;;  %v1293_v43 = vld [vmem:[%s1226_s14 + $0x40] sm:$0xff]  ;;  %v1296_v44 = vld [vmem:[%s1226_s14 + $0x48] sm:$0xff]  ;;  %v1299_v50 = vld [vmem:[%s1226_s14 + $0x38] sm:$0xff] }
  0x39   : > { %956 = vpow2.f32 %v437_v51  ;;  %v588_v14 = vmax.f32 %v1246_v4, %v1249_v5  ;;  %v449_v18 = vsel %vm448_vm1, %v1144_v24, 0.0  ;;  %vm450_vm2 = vcmp.eq.s32.totalorder %v1222_v59, 1 }
  0x3a   : > { %958 = vpow2.f32 %v441_v53  ;;  %v500_v8 = vsub.f32 %v1182_v38, %v1240_v2  ;;  %v503_v9 = vsub.f32 %v1185_v39, %v1240_v2  ;;  %v507_v10 = vsub.f32 %v1205_v47, %v1240_v2 }
  0x3b   : > { %960 = vpow2.f32 %v468_v54  ;;  %v511_v12 = vsub.f32 %v1214_v56, %v1240_v2  ;;  %v551_v13 = vmax.f32 %v550_v7, %v1243_v3  ;;  %vm452_vm3 = vcmp.eq.s32.totalorder %v1222_v59, 2  ;;  %v1314_v7 = vld [vmem:[%s1226_s14 + $0x50] sm:$0xff] }
  0x3c   : > { %962 = vpow2.f32 %v471_v60  ;;  %v501_v15 = vmul.f32 1.442695, %v500_v8  ;;  %v504_v16 = vmul.f32 1.442695, %v503_v9  ;;  %v508_v17 = vmul.f32 1.442695, %v507_v10 }
  0x3d   : > { %964 = vpow2.f32 %v475_v0  ;;  %v512_v19 = vmul.f32 1.442695, %v511_v12  ;;  %v1274_v20 = vmax.f32 %v551_v13, %v1262_v11  ;;  %v451_v35 = vsel %vm450_vm2, %v1147_v25, %v449_v18 }
  0x3e   : > { %966 = vpow2.f32 %v479_v1  ;;  %v589_v42 = vmax.f32 %v588_v14, %v1277_v21  ;;  %v413_v25 = vand.u32 127, %v410_v6  ;;  %v417_v52 = vmul.u32 128, %v411_v22 }
  0x3f   : > { %968 = vpow2.f32 %v501_v15  ;;  %v553_v24 = vsub.f32 %v1229_v62, %v1274_v20  ;;  %v556_v27 = vsub.f32 %v1232_v63, %v1274_v20  ;;  %v560_v32 = vsub.f32 %v1243_v3, %v1274_v20 }
  0x40   : > { %970 = vpow2.f32 %v504_v16  ;;  %v564_v41 = vsub.f32 %v1262_v11, %v1274_v20  ;;  %vm454_vm4 = vcmp.eq.s32.totalorder %v1222_v59, 3  ;;  %v626_v60 = vmax.f32 %v1293_v43, %v1296_v44 }
  0x41   : > { %v953_v23 = vpop.eup %952  ;;  %972 = vpow2.f32 %v508_v17  ;;  %v554_v48 = vmul.f32 1.442695, %v553_v24  ;;  %v557_v49 = vmul.f32 1.442695, %v556_v27  ;;  %v561_v53 = vmul.f32 1.442695, %v560_v32 }
  0x42   : > { %v955_v33 = vpop.eup %954  ;;  %974 = vpow2.f32 %v512_v19  ;;  %v565_v54 = vmul.f32 1.442695, %v564_v41  ;;  %v453_v0 = vsel %vm452_vm3, %v1150_v26, %v451_v35  ;;  %v485_v1 = vsel %vm448_vm1, %v1155_v28, 0.0  ;;  %v1333_v24 = vld [vmem:[%s1226_s14 + $0x58] sm:$0xff] }
  0x43   : > { %v957_v45 = vpop.eup %956  ;;  %v435_v46 = vadd.f32 %v955_v33, %v953_v23  ;;  %976 = vpow2.f32 %v554_v48  ;;  %v1311_v6 = vmax.f32 %v589_v42, %v1299_v50  ;;  %vm571_vm5 = vcmp.eq.f32.partialorder %v1262_v11, %v1274_v20 }
  0x44   : > { %v959_v51 = vpop.eup %958  ;;  %978 = vpow2.f32 %v557_v49  ;;  %v627_v16 = vmax.f32 %v626_v60, %v1314_v7  ;;  %v486_v18 = vsel %vm450_vm2, %v1158_v29, %v485_v1  ;;  %v1330_v19 = vadd.s32 %v417_v52, %v413_v25 }
  0x45   : > { %v961_v55 = vpop.eup %960  ;;  %v439_v58 = vadd.f32 %v957_v45, %v435_v46  ;;  %980 = vpow2.f32 %v561_v53  ;;  %v591_v26 = vsub.f32 %v1246_v4, %v1311_v6  ;;  %v594_v28 = vsub.f32 %v1249_v5, %v1311_v6 }
  0x46   : > { %v963_v61 = vpop.eup %962  ;;  %982 = vpow2.f32 %v565_v54  ;;  %v598_v13 = vsub.f32 %v1277_v21, %v1311_v6  ;;  %v602_v15 = vsub.f32 %v1299_v50, %v1311_v6  ;;  %v1053_v33 = vmov 4  }
  0x47   : > { %v965_v8 = vpop.eup %964  ;;  %v443_v9 = vadd.f32 %v959_v51, %v439_v58  ;;  %v473_v10 = vadd.f32 %v963_v61, %v961_v55  ;;  %v592_v22 = vmul.f32 1.442695, %v591_v26  ;;  %v595_v23 = vmul.f32 1.442695, %v594_v28 }
  0x48   : > { %v967_v12 = vpop.eup %966  ;;  %v572_v35 = vsel %vm571_vm5, 3, %v1053_v33  ;;  %vm573_vm6 = vcmp.eq.f32.partialorder %v1243_v3, %v1274_v20  ;;  %v599_v41 = vmul.f32 1.442695, %v598_v13  ;;  %v1343_v29 = vsel %vm454_vm4, %v1164_v30, %v453_v0 }
  0x49   : > { %984 = vlog2.f32 %v443_v9  ;;  %v477_v14 = vadd.f32 %v965_v8, %v473_v10  ;;  %v969_v17 = vpop.eup %968  ;;  %v603_v46 = vmul.f32 1.442695, %v602_v15  ;;  %v487_v49 = vsel %vm452_vm3, %v1167_v31, %v486_v18 }
  0x4a   : > { %v971_v27 = vpop.eup %970  ;;  %986 = vpow2.f32 %v592_v22  ;;  %v518_v51 = vsel %vm448_vm1, %v1182_v38, 0.0  ;;  %v1352_v25 = vmax.f32 %v627_v16, %v1333_v24  ;;  %v574_v53 = vsel %vm573_vm6, 2, %v572_v35 }
  0x4b   : > { %v481_v32 = vadd.f32 %v967_v12, %v477_v14  ;;  %v973_v42 = vpop.eup %972  ;;  %v506_v45 = vadd.f32 %v971_v27, %v969_v17  ;;  %vm575_vm7 = vcmp.eq.f32.partialorder %v1232_v63, %v1274_v20  ;;  %vm609_vm8 = vcmp.eq.f32.partialorder %v1299_v50, %v1311_v6 }
  0x4c   : > { %v975_v48 = vpop.eup %974  ;;  %v629_v54 = vsub.f32 %v1293_v43, %v1352_v25  ;;  %v632_v31 = vsub.f32 %v1296_v44, %v1352_v25  ;;  %v636_v38 = vsub.f32 %v1314_v7, %v1352_v25  ;;  %v640_v60 = vsub.f32 %v1333_v24, %v1352_v25 }
  0x4d   : > { %988 = vlog2.f32 %v481_v32  ;;  %v510_v52 = vadd.f32 %v973_v42, %v506_v45  ;;  %v977_v30 = vpop.eup %976  ;;  %vm419_vm9 = vcmp.lt.s32.totalorder %v1330_v19, 256  ;;  %vm647_vm10 = vcmp.eq.f32.partialorder %v1333_v24, %v1352_v25 }
  0x4e   : > { %990 = vpow2.f32 %v595_v23  ;;  %v979_v55 = vpop.eup %978  ;;  %v630_v1 = vmul.f32 1.442695, %v629_v54  ;;  %v633_v8 = vmul.f32 1.442695, %v632_v31  ;;  %v637_v9 = vmul.f32 1.442695, %v636_v38 }
  0x4f   : > { %992 = vpow2.f32 %v599_v41  ;;  %v514_v58 = vadd.f32 %v975_v48, %v510_v52  ;;  %v981_v61 = vpop.eup %980  ;;  %v559_v0 = vadd.f32 %v979_v55, %v977_v30  ;;  %v641_v12 = vmul.f32 1.442695, %v640_v60 }
  0x50   : > { %994 = vpow2.f32 %v603_v46  ;;  %v983_v10 = vpop.eup %982  ;;  %v576_v13 = vsel %vm575_vm7, 1, %v574_v53  ;;  %vm577_vm11 = vcmp.eq.f32.partialorder %v1229_v62, %v1274_v20  ;;  %v610_v15 = vsel %vm609_vm8, 3, %v1053_v33 }
  0x51   : > { %996 = vlog2.f32 %v514_v58  ;;  %v563_v28 = vadd.f32 %v981_v61, %v559_v0  ;;  %vm611_vm12 = vcmp.eq.f32.partialorder %v1277_v21, %v1311_v6  ;;  %v648_v17 = vsel %vm647_vm10, 3, %v1053_v33 }
  0x52   : > { %998 = vpow2.f32 %v630_v1  ;;  %vm649_vm13 = vcmp.eq.f32.partialorder %v1314_v7, %v1352_v25  ;;  %v488_v23 = vsel %vm454_vm4, %v1173_v34, %v487_v49  ;;  %v578_v27 = vsel %vm577_vm11, 0, %v576_v13 }
  0x53   : > { %v985_v26 = vpop.eup %984  ;;  %1000 = vpow2.f32 %v633_v8  ;;  %v567_v16 = vadd.f32 %v983_v10, %v563_v28  ;;  %v519_v35 = vsel %vm450_vm2, %v1185_v39, %v518_v51  ;;  %vm613_vm15 = vcmp.eq.f32.partialorder %v1249_v5, %v1311_v6 }
  0x54   : > { %v445_v14 = vmul.f32 0.6931472, %v985_v26  ;;  %1002 = vpow2.f32 %v637_v9  ;;  %v987_v18 = vpop.eup %986  ;;  %v612_v42 = vsel %vm611_vm12, 2, %v610_v15  ;;  %v650_v39 = vsel %vm649_vm13, 2, %v648_v17 }
  0x55   : > { %1004 = vpow2.f32 %v641_v12  ;;  %vm579_vm14 = vcmp.le.f32.partialorder %v567_v16, 1.4285715  ;;  %vm651_vm2 = vcmp.eq.f32.partialorder %v1296_v44, %v1352_v25  ;;  %v520_v52 = vsel %vm452_vm3, %v1205_v47, %v519_v35 }
  0x56   : > { %v446_v22 = vadd.f32 %v445_v14, %v1179_v37  ;;  %1006 = vlog2.f32 %v567_v16  ;;  %vm1393_vm1 = vmand %vm579_vm14, %vm419_vm9  ;;  %v614_v30 = vsel %vm613_vm15, 1, %v612_v42  ;;  %vm615_vm6 = vcmp.eq.f32.partialorder %v1246_v4, %v1311_v6 }
  0x57   : > { %v989_v32 = vpop.eup %988  ;;  %v1408_v46 = vsel %vm1393_vm1, %v578_v27, 0  ;;  %vm653_vm7 = vcmp.eq.f32.partialorder %v1293_v43, %v1352_v25  ;;  %v521_v1 = vsel %vm454_vm4, %v1214_v56, %v520_v52  ;;  %v616_v8 = vsel %vm615_vm6, 0, %v614_v30 }
  0x58   : > { %v991_v33 = vpop.eup %990  ;;  %v456_v41 = vsub.f32 %v446_v22, %v1343_v29  ;;  %v483_v37 = vmul.f32 0.6931472, %v989_v32  ;;  %v881_v29 = vsel %vm1393_vm1, 1.0, %v1052_v57  ;;  %vm681_vm5 = vcmp.eq.s32.totalorder %v1408_v46, 0 }
  0x59   : > { %v993_v45 = vpop.eup %992  ;;  %v597_v48 = vadd.f32 %v991_v33, %v987_v18  ;;  %883 = vst [vmem:[%s1237_s25 + $0x10] sm:$0xff] %v881_v29  ;;  %v682_v60 = vsel %vm681_vm5, %v1246_v4, 0.0  ;;  %vm683_vm3 = vcmp.eq.s32.totalorder %v1408_v46, 1  ;;  %vm685_vm4 = vcmp.eq.s32.totalorder %v1408_v46, 2 }
  0x5a   : > { %v995_v49 = vpop.eup %994  ;;  %v484_v51 = vadd.f32 %v483_v37, %v1188_v40  ;;  %v457_v31 = vsel %vm421_vm0, %v456_v41, 0.0  ;;  %v652_v40 = vsel %vm651_vm2, 1, %v650_v39  ;;  %v684_v56 = vsel %vm683_vm3, %v1249_v5, %v682_v60 }
  0x5b   : > { %v601_v53 = vadd.f32 %v993_v45, %v597_v48  ;;  %v997_v54 = vpop.eup %996  ;;  %v654_v26 = vsel %vm653_vm7, 0, %v652_v40  ;;  %v686_v37 = vsel %vm685_vm4, %v1277_v21, %v684_v56  ;;  %v712_v42 = vsel %vm681_vm5, %v1293_v43, 0.0 }
  0x5c   : > { %v489_v38 = vsub.f32 %v484_v51, %v488_v23  ;;  %v999_v55 = vpop.eup %998  ;;  %v516_v47 = vmul.f32 0.6931472, %v997_v54 }
  0x5d   : > { %v605_v58 = vadd.f32 %v995_v49, %v601_v53  ;;  %v1001_v61 = vpop.eup %1000 }
  0x5e   : > { %v490_v0 = vsel %vm421_vm0, %v489_v38, 0.0  ;;  %v1003_v9 = vpop.eup %1002  ;;  %v517_v10 = vadd.f32 %v516_v47, %v1240_v2  ;;  %v635_v12 = vadd.f32 %v1001_v61, %v999_v55 }
  0x5f   : > { %vm617_vm8 = vcmp.le.f32.partialorder %v605_v58, 1.4285715  ;;  %v1005_v28 = vpop.eup %1004  ;;  %v491_v13 = vadd.f32 %v490_v0, %v457_v31  ;;  %1008 = vlog2.f32 %v605_v58 }
  0x60   : > { %vm1439_vm10 = vmand %vm617_vm8, %vm419_vm9  ;;  %v1007_v59 = vpop.eup %1006  ;;  %v522_v2 = vsub.f32 %v517_v10, %v521_v1  ;;  %v639_v17 = vadd.f32 %v1003_v9, %v635_v12 }
  0x61   : > { %v884_v15 = vsel %vm1439_vm10, 1.0, %v1052_v57  ;;  %v664_v16 = vsel %vm1439_vm10, %v616_v8, 0  ;;  %v569_v18 = vmul.f32 0.6931472, %v1007_v59 }
  0x62   : > { %vm665_vm11 = vcmp.eq.s32.totalorder %v664_v16, 0  ;;  %vm667_vm12 = vcmp.eq.s32.totalorder %v664_v16, 1  ;;  %v523_v22 = vsel %vm421_vm0, %v522_v2, 0.0  ;;  %v643_v23 = vadd.f32 %v1005_v28, %v639_v17  ;;  %886 = vst [vmem:[%s1237_s25 + $0x18] sm:$0xff] %v884_v15 }
  0x63   : > { %v666_v27 = vsel %vm665_vm11, %v1229_v62, 0.0  ;;  %vm669_vm13 = vcmp.eq.s32.totalorder %v664_v16, 2  ;;  %v524_v32 = vadd.f32 %v523_v22, %v491_v13  ;;  %v570_v35 = vadd.f32 %v569_v18, %v1274_v20 }
  0x64   : > { %v668_v33 = vsel %vm667_vm12, %v1232_v63, %v666_v27  ;;  %vm671_vm14 = vcmp.eq.s32.totalorder %v664_v16, 3  ;;  %vm655_vm15 = vcmp.le.f32.partialorder %v643_v23, 1.4285715  ;;  %vm687_vm0 = vcmp.eq.s32.totalorder %v1408_v46, 3 }
  0x65   : > { %v670_v41 = vsel %vm669_vm13, %v1243_v3, %v668_v33  ;;  %1010 = vlog2.f32 %v643_v23  ;;  %vm1465_vm2 = vmand %vm655_vm15, %vm419_vm9  ;;  %v734_v29 = vsel %vm665_vm11, %v1293_v43, 0.0  ;;  %528 = vst [vmem:[%s1237_s25] sm:$0xff] %v524_v32  ;;  %v713_v43 = vsel %vm683_vm3, %v1296_v44, %v712_v42 }
  0x66   : > { %v672_v20 = vsel %vm671_vm14, %v1262_v11, %v670_v41  ;;  %v887_v19 = vsel %vm1465_vm2, 1.0, %v1052_v57  ;;  %v696_v39 = vsel %vm1465_vm2, %v654_v26, 0 }
  0x67   : > { %v673_v45 = vsub.f32 %v570_v35, %v672_v20  ;;  %vm697_vm9 = vcmp.eq.s32.totalorder %v696_v39, 0  ;;  %vm699_vm6 = vcmp.eq.s32.totalorder %v696_v39, 1  ;;  %vm701_vm7 = vcmp.eq.s32.totalorder %v696_v39, 2  ;;  %889 = vst [vmem:[%s1237_s25 + $0x20] sm:$0xff] %v887_v19 }
  0x68   : > { %v698_v49 = vsel %vm697_vm9, %v1229_v62, 0.0  ;;  %vm703_vm5 = vcmp.eq.s32.totalorder %v696_v39, 3  ;;  %v723_v57 = vsel %vm697_vm9, %v1246_v4, 0.0  ;;  %v735_v62 = vsel %vm667_vm12, %v1296_v44, %v734_v29 }
  0x69   : > { %v674_v48 = vsel %vm1439_vm10, %v673_v45, 0.0  ;;  %v1009_v51 = vpop.eup %1008  ;;  %v700_v52 = vsel %vm699_vm6, %v1232_v63, %v698_v49  ;;  %v724_v53 = vsel %vm699_vm6, %v1249_v5, %v723_v57  ;;  %v688_v4 = vsel %vm687_vm0, %v1299_v50, %v686_v37 }
  0x6a   : > { %v607_v30 = vmul.f32 0.6931472, %v1009_v51  ;;  %v702_v54 = vsel %vm701_vm7, %v1243_v3, %v700_v52  ;;  %v725_v31 = vsel %vm701_vm7, %v1277_v21, %v724_v53  ;;  %891 = vst [vmem:[%s1237_s25 + $0x28] sm:$0xff] %v674_v48  ;;  %v714_v3 = vsel %vm685_vm4, %v1314_v7, %v713_v43 }
  0x6b   : > { %v704_v63 = vsel %vm703_vm5, %v1262_v11, %v702_v54  ;;  %v726_v38 = vsel %vm703_vm5, %v1299_v50, %v725_v31  ;;  %v736_v21 = vsel %vm669_vm13, %v1314_v7, %v735_v62  ;;  %v715_v58 = vsel %vm687_vm0, %v1333_v24, %v714_v3 }
  0x6c   : > { %v608_v5 = vadd.f32 %v607_v30, %v1311_v6  ;;  %v705_v40 = vsub.f32 %v570_v35, %v704_v63  ;;  %v737_v7 = vsel %vm671_vm14, %v1333_v24, %v736_v21 }
  0x6e   : > { %v689_v55 = vsub.f32 %v608_v5, %v688_v4  ;;  %v706_v11 = vsel %vm1465_vm2, %v705_v40, 0.0  ;;  %v727_v50 = vsub.f32 %v608_v5, %v726_v38 }
  0x6f   : > { %v1011_v44 = vpop.eup %1010  ;;  %895 = vst [vmem:[%s1237_s25 + $0x38] sm:$0xff] %v706_v11 }
  0x70   : > { %v645_v47 = vmul.f32 0.6931472, %v1011_v44  ;;  %v690_v6 = vsel %vm1393_vm1, %v689_v55, 0.0  ;;  %v728_v60 = vsel %vm1465_vm2, %v727_v50, 0.0 }
  0x71   : > { %893 = vst [vmem:[%s1237_s25 + $0x30] sm:$0xff] %v690_v6  ;;  %899 = vst [vmem:[%s1237_s25 + $0x48] sm:$0xff] %v728_v60 }
  0x72   : > { %v646_v61 = vadd.f32 %v645_v47, %v1352_v25 }
  0x74   : > { %v716_v0 = vsub.f32 %v646_v61, %v715_v58  ;;  %v738_v1 = vsub.f32 %v646_v61, %v737_v7 }
  0x76   : > { %v717_v8 = vsel %vm1393_vm1, %v716_v0, 0.0  ;;  %v739_v46 = vsel %vm1439_vm10, %v738_v1, 0.0 }
  0x77   : > { %897 = vst [vmem:[%s1237_s25 + $0x40] sm:$0xff] %v717_v8  ;;  %901 = vst [vmem:[%s1237_s25 + $0x50] sm:$0xff] %v739_v46 }
  0x78 PF: > { %s13_s16 = sadd.s32 1, %s1050_s16   ;;  %s1558_s12 = smov %s1038_s13 }
  0x79   : > { %p10_p10 = scmp.ge.s32.totalorder %s13_s16, 4   ;;  %s1559_s13 = smov %s1113_s21 }
  0x7a   : > { %s1560_s14 = smov %s1046_s15  ;;  %s1561_s15 = smov %s1563_s17 }
  0x7b   :  { %12 = sbr.rel (!%p10_p10) target bundleno = 3 (0x3), region = 172 }

</bundles_post_ra>
